<compile_context>
chip_gen: v5e
topology: v5e:2x2
jax: 0.10.0
libtpu: 0.0.40
codegen_flags: <defaults>
</compile_context>

<pallas_src>
import functools

import jax
import jax.numpy as jnp
from jax import lax
from jax.experimental import pallas as pl
from jax.experimental.pallas import tpu as pltpu


# ------------------------- in-kernel math helpers -------------------------

def _log_softmax(z):
    m = jnp.max(z, axis=-1, keepdims=True)
    s = z - m
    return s - jnp.log(jnp.sum(jnp.exp(s), axis=-1, keepdims=True))


def _softmax(z):
    m = jnp.max(z, axis=-1, keepdims=True)
    e = jnp.exp(z - m)
    return e / jnp.sum(e, axis=-1, keepdims=True)


# --------------------------------- kernel ---------------------------------

def _loss_kernel(margin, domain_num, original, S, NL, tile_rows, tiles_per_split,
                 stypred_cont_ref, sty_aug_ref, pred_cont_ref, pred_sty_ref,
                 stylabels_ref, y_ref, d_ref, x_ref, xr_ref,
                 out_ref, acc_ref):
    f32 = jnp.float32
    N, C = pred_sty_ref.shape
    Nh = N // 2
    DN = domain_num
    c = pl.program_id(0)                     # "parallel" split (TensorCore) axis
    t = pl.program_id(1)                     # "arbitrary" streaming axis
    last = pl.num_programs(1) - 1

    sub = lax.broadcasted_iota(jnp.int32, (8, 128), 0)
    lane = lax.broadcasted_iota(jnp.int32, (8, 128), 1)

    def put(k):
        # one-hot (8,128) selector for sublane 0 / lane k of the partials tile
        return jnp.logical_and(sub == 0, lane == k).astype(f32)

    # ---- init this split's accumulator tile on its first step ----
    @pl.when(t == 0)
    def _():
        acc_ref[...] = jnp.zeros_like(acc_ref)

    # ---- scan-independent small-tensor losses: split 0, step 0 only ----
    # (overlaps with the in-flight DMAs of the following streaming steps)
    @pl.when(jnp.logical_and(t == 0, c == 0))
    def _():
        # cross entropy (the original "+1e-6" on logits is a softmax no-op)
        y = y_ref[...]                                           # (N,1) int32
        col_c = lax.broadcasted_iota(jnp.int32, (N, C), 1)
        y1h = (col_c == y).astype(f32)

        def cross_entropy(logits):
            return -jnp.sum(_log_softmax(logits) * y1h) / N      # scalar

        ce_sty = cross_entropy(pred_sty_ref[...])
        ce_cont = cross_entropy(pred_cont_ref[...])

        # styloss_cont: KLDiv(batchmean)(log softmax(stypred_cont), softmax(stylabels))
        lsm_lab = _log_softmax(stylabels_ref[...])
        p_lab = jnp.exp(lsm_lab)
        logq = _log_softmax(stypred_cont_ref[...])
        kl_cont = jnp.sum(p_lab * (lsm_lab - logq)) / N

        # Triple_Loss(stypred_sty, D): fused one-hot scatter-mean (nega domain
        # ids were offset by domain_num and a ones column appended in the
        # wrapper, so one small dot_general yields both sums and counts).
        if original:
            sty_aug = sty_aug_ref[...]                           # (N, S+1)
            sty = sty_aug[:, :S]
            d = d_ref[...]                                       # (N,1) int32
            dom = lax.broadcasted_iota(jnp.int32, (N, 2 * DN), 1)
            onehot = (dom == d).astype(f32)                      # (N, 2*DN)
            dims = (((0,), (0,)), ((), ()))
            prods = lax.dot_general(onehot, sty_aug, dims,
                                    preferred_element_type=f32)  # (2*DN, S+1)
            sums = prods[:, :S]
            counts = prods[:, S:S + 1]
            mean = sums / jnp.maximum(counts, 1.0)
            anch = _softmax(mean)                                # (2*DN, S)
            pa = jnp.sum(anch[:DN], axis=0, keepdims=True) / DN  # (1, S)
            na = jnp.sum(anch[DN:], axis=0, keepdims=True) / DN
            # Collapsed broadcast-KLs:
            #   kl(log_q, p) = sum_s p_s log p_s - (1/Nh) sum_s p_s colsum(log_q)_s
            cs_lp = jnp.sum(_log_softmax(sty[:Nh]), axis=0, keepdims=True)
            cs_ln = jnp.sum(_log_softmax(sty[Nh:]), axis=0, keepdims=True)
            ent_pa = jnp.sum(pa * jnp.log(pa))
            ent_na = jnp.sum(na * jnp.log(na))
            inv_nh = 1.0 / Nh
            kl_pp = ent_pa - inv_nh * jnp.sum(pa * cs_lp)
            kl_np = ent_na - inv_nh * jnp.sum(na * cs_lp)
            kl_nn = ent_na - inv_nh * jnp.sum(na * cs_ln)
            kl_pn = ent_pa - inv_nh * jnp.sum(pa * cs_ln)
            triple = (jnp.maximum(margin + kl_pp - kl_np, 0.0) +
                      jnp.maximum(margin + kl_nn - kl_pn, 0.0))
        else:
            triple = jnp.zeros((), f32)

        acc_ref[...] += (put(2) * kl_cont + put(3) * triple
                         + put(4) * ce_cont + put(5) * ce_sty)

    # ---- streaming masked-L1 reconstruction partials on this tile ----
    blk = c * tiles_per_split + t                          # unclamped tile index
    row = lax.broadcasted_iota(jnp.int32, (tile_rows, 1), 0) + blk * tile_rows
    in_bounds = row < NL                                    # ragged-tail mask
    x = x_ref[...].astype(f32)                              # (tile_rows, F)
    xr = xr_ref[...].astype(f32)
    row_sum = jnp.sum(x, axis=1, keepdims=True)             # (tile_rows, 1)
    m = jnp.logical_and(in_bounds, row_sum != 0.0)
    abs_row = jnp.sum(jnp.abs(xr - x), axis=1, keepdims=True)
    num_tile = jnp.sum(jnp.where(m, abs_row, 0.0))          # where(): NaN-safe
    cnt_tile = jnp.sum(jnp.where(m, 1.0, 0.0))
    acc_ref[...] += put(0) * num_tile + put(1) * cnt_tile

    # ---- write this split's lane-dense partials tile on its last step ----
    @pl.when(t == last)
    def _():
        out_ref[...] = acc_ref[...]


# -------------------------------- wrapper ---------------------------------

def loss_function_triple_loss(preds, targets, *, margin=0.5, domain_num=4, original=True):
    """Returns (loss, styloss_cont, styloss_sty, clsloss_cont, clsloss_sty, loss_rec)."""
    stypred_cont, stypred_sty, pred_cont, pred_sty, x_rec, cont, sty = preds  # cont/sty unused
    stylabels, y, x, D = targets

    f32 = jnp.float32
    N, L, F = x.shape
    S = stypred_sty.shape[-1]
    C = pred_sty.shape[-1]
    Nh = N // 2
    NL = N * L

    def _cdiv(a, b):
        return -(-a // b)

    def _round_up(a, b):
        return _cdiv(a, b) * b

    # Big tensors: free row-major reshape, native dtype, no pad/transpose.
    x2 = x.reshape(NL, F)
    xr2 = x_rec.reshape(NL, F)
    itemsize = jnp.dtype(x.dtype).itemsize

    # Generation-aware tile target + VMEM limit.
    try:
        vmem_cap = int(pltpu.get_tpu_info().vmem_capacity_bytes)
    except Exception:
        vmem_cap = 64 << 20                       # conservative (v7x-sized)
    if vmem_cap <= (64 << 20):                    # v7x-class: 64 MiB per TC
        tile_target, vmem_limit = 4 << 20, 48 << 20
    else:                                         # v5e / v6e: 128 MiB physical
        tile_target, vmem_limit = 6 << 20, 64 << 20

    rows_target = max(8, (tile_target // max(1, itemsize * F)) // 8 * 8)
    tile_rows = min(_round_up(NL, 8), rows_target)
    num_blocks = _cdiv(NL, tile_rows)
    # TODO(synk): query the actual TensorCore count; the 2-way split only buys
    # bandwidth on v7x but is a harmless serial loop on single-core chips.
    nsplit = 2 if num_blocks >= 2 else 1
    tps = _cdiv(num_blocks, nsplit)

    y2 = y.reshape(N, 1).astype(jnp.int32)
    # Nega half's domain ids offset by domain_num -> one fused scatter-mean matmul.
    d_comb = jnp.concatenate([D[:Nh], D[Nh:] + domain_num]).reshape(N, 1).astype(jnp.int32)
    # Ones column appended so sums and counts come from a single dot_general.
    sty_aug = jnp.concatenate([stypred_sty.astype(f32), jnp.ones((N, 1), f32)], axis=1)

    kernel = functools.partial(_loss_kernel, float(margin), int(domain_num),
                               bool(original), int(S), int(NL), int(tile_rows), int(tps))

    def full(shape):
        return pl.BlockSpec(shape, lambda c, t: (0, 0))

    def big_map(c, t):
        # Clamp so the DMA never targets a fully out-of-range block; the kernel
        # masks contributions with the unclamped global row index.
        return (jnp.minimum(c * tps + t, num_blocks - 1), 0)

    out = pl.pallas_call(
        kernel,
        out_shape=jax.ShapeDtypeStruct((8, nsplit * 128), f32),
        grid=(nsplit, tps),
        in_specs=[full((N, S)),                                   # stypred_cont
                  full((N, S + 1)),                               # stypred_sty + ones col
                  full((N, C)),                                   # pred_cont
                  full((N, C)),                                   # pred_sty
                  full((N, S)),                                   # stylabels
                  full((N, 1)),                                   # y
                  full((N, 1)),                                   # D (combined)
                  pl.BlockSpec((tile_rows, F), big_map),          # x
                  pl.BlockSpec((tile_rows, F), big_map)],         # x_rec
        out_specs=pl.BlockSpec((8, 128), lambda c, t: (0, c)),
        scratch_shapes=[pltpu.VMEM((8, 128), f32)],
        compiler_params=pltpu.CompilerParams(
            dimension_semantics=("parallel", "arbitrary"),
            vmem_limit_bytes=vmem_limit),
    )(stypred_cont.astype(f32), sty_aug, pred_cont.astype(f32), pred_sty.astype(f32),
      stylabels.astype(f32), y2, d_comb, x2, xr2)

    # Trivial follow-up combine of the per-split partials (O(nsplit*128) work).
    parts = out[0].reshape(nsplit, 128)
    num = jnp.sum(parts[:, 0])
    cnt = jnp.sum(parts[:, 1])
    rec = num / (cnt * F) + margin
    kl_cont = parts[0, 2]
    triple = parts[0, 3]
    ce_cont = parts[0, 4]
    ce_sty = parts[0, 5]
    total = kl_cont + triple + (ce_sty + ce_cont) * 0.5 + rec
    return total, kl_cont, triple, ce_cont, ce_sty, rec


# ------------------------ pure-JAX reference (check) -----------------------

def _reference(preds, targets, margin, domain_num):
    stypred_cont, stypred_sty, pred_cont, pred_sty, x_rec, cont, sty = preds
    stylabels, y, x, D = targets
    N = pred_sty.shape[0]
    Nh = N // 2

    def ce(logits, labels):
        lsm = jax.nn.log_softmax(logits + 1e-6, axis=-1)
        return -jnp.mean(jnp.take_along_axis(lsm, labels[:, None], axis=-1))

    ce_sty = ce(pred_sty, y)
    ce_cont = ce(pred_cont, y)

    sel = (x.sum(-1) != 0).astype(jnp.float32)
    rec = jnp.sum(jnp.abs(x_rec - x) * sel[..., None]) / (jnp.sum(sel) * x.shape[-1]) + margin

    def kl_bm(log_q, p):
        return jnp.sum(p * (jnp.log(p) - log_q)) / log_q.shape[0]

    kl_cont = kl_bm(jax.nn.log_softmax(stypred_cont, axis=-1),
                    jax.nn.softmax(stylabels, axis=-1))

    posi, nega = stypred_sty[:Nh], stypred_sty[Nh:]
    pd, nd = D[:Nh], D[Nh:]

    def anchor_mean(chunk, cd):
        m = jax.nn.one_hot(cd, domain_num, dtype=jnp.float32)
        sums = jnp.einsum('nd,ns->ds', m, chunk, precision=jax.lax.Precision.HIGHEST)
        counts = jnp.sum(m, axis=0)[:, None]
        a = jax.nn.softmax(sums / jnp.maximum(counts, 1.0), axis=-1)
        return jnp.mean(a, axis=0, keepdims=True)

    pa = anchor_mean(posi, pd)
    na = anchor_mean(nega, nd)
    lp = jax.nn.log_softmax(posi, axis=-1)
    ln = jax.nn.log_softmax(nega, axis=-1)
    triple = (jnp.maximum(margin + kl_bm(lp, jnp.broadcast_to(pa, lp.shape))
                          - kl_bm(lp, jnp.broadcast_to(na, lp.shape)), 0.0) +
              jnp.maximum(margin + kl_bm(ln, jnp.broadcast_to(na, ln.shape))
                          - kl_bm(ln, jnp.broadcast_to(pa, ln.shape)), 0.0))

    loss = kl_cont + triple + (ce_sty + ce_cont) * 0.5 + rec
    return loss, kl_cont, triple, ce_cont, ce_sty, rec


# ---------------------------------- main -----------------------------------

if __name__ == "__main__":
    key = jax.random.PRNGKey(0)
    N, C, S, DN = 8, 4, 8, 4      # batch (even), classes, style dim, domain_num
    L, F = 8, 16                  # sequence length, feature dim of x / x_rec
    margin = 0.5

    ks = jax.random.split(key, 10)
    stypred_cont = jax.random.normal(ks[0], (N, S), jnp.float32)
    stypred_sty = jax.random.normal(ks[1], (N, S), jnp.float32)
    pred_cont = jax.random.normal(ks[2], (N, C), jnp.float32)
    pred_sty = jax.random.normal(ks[3], (N, C), jnp.float32)
    x = jax.random.normal(ks[4], (N, L, F), jnp.float32)
    # zero some rows so the nonzero-row selection in Reconstruction_Loss matters
    x = x.at[0, 0, :].set(0.0).at[3, 5, :].set(0.0)
    x_rec = jax.random.normal(ks[5], (N, L, F), jnp.float32)
    cont = jax.random.normal(ks[6], (N, S), jnp.float32)   # unused by forward
    sty = jax.random.normal(ks[7], (N, S), jnp.float32)    # unused by forward
    stylabels = jax.random.normal(ks[8], (N, S), jnp.float32)
    y = jax.random.randint(ks[9], (N,), 0, C, jnp.int32)
    D = jax.random.randint(jax.random.fold_in(key, 123), (N,), 0, DN, jnp.int32)

    preds = (stypred_cont, stypred_sty, pred_cont, pred_sty, x_rec, cont, sty)
    targets = (stylabels, y, x, D)

    outs = loss_function_triple_loss(preds, targets, margin=margin, domain_num=DN,
                                     original=True)
    outs = jax.block_until_ready(outs)

    ref = _reference(preds, targets, margin, DN)
    for got, want in zip(outs, ref):
        assert jnp.allclose(got, want, rtol=5e-3, atol=5e-3), (got, want)

    print("KERNEL_OK")
</pallas_src>

<mosaic_0001>
module attributes {stable_mosaic.version = 11 : i64} {
  func.func @_loss_kernel(%arg0: i32, %arg1: i32, %arg2: memref<8x8xf32, #tpu.memory_space<vmem>>, %arg3: memref<8x9xf32, #tpu.memory_space<vmem>>, %arg4: memref<8x4xf32, #tpu.memory_space<vmem>>, %arg5: memref<8x4xf32, #tpu.memory_space<vmem>>, %arg6: memref<8x8xf32, #tpu.memory_space<vmem>>, %arg7: memref<8x1xi32, #tpu.memory_space<vmem>>, %arg8: memref<8x1xi32, #tpu.memory_space<vmem>>, %arg9: memref<64x16xf32, #tpu.memory_space<vmem>>, %arg10: memref<64x16xf32, #tpu.memory_space<vmem>>, %arg11: memref<8x128xf32, #tpu.memory_space<vmem>>, %arg12: memref<8x128xf32, #tpu.memory_space<vmem>>) attributes {dimension_semantics = [#tpu.dimension_semantics<parallel>, #tpu.dimension_semantics<arbitrary>], iteration_bounds = array<i64: 1, 1>, scalar_prefetch = 0 : i64, scratch_operands = 1 : i64, tpu.core_type = #tpu.core_type<tc>, window_params = [{pipeline_mode = #tpu.pipeline_mode<synchronous>, transform_indices = @transform_0, window_bounds = array<i64: 8, 8>}, {pipeline_mode = #tpu.pipeline_mode<synchronous>, transform_indices = @transform_1, window_bounds = array<i64: 8, 9>}, {pipeline_mode = #tpu.pipeline_mode<synchronous>, transform_indices = @transform_2, window_bounds = array<i64: 8, 4>}, {pipeline_mode = #tpu.pipeline_mode<synchronous>, transform_indices = @transform_3, window_bounds = array<i64: 8, 4>}, {pipeline_mode = #tpu.pipeline_mode<synchronous>, transform_indices = @transform_4, window_bounds = array<i64: 8, 8>}, {pipeline_mode = #tpu.pipeline_mode<synchronous>, transform_indices = @transform_5, window_bounds = array<i64: 8, 1>}, {pipeline_mode = #tpu.pipeline_mode<synchronous>, transform_indices = @transform_6, window_bounds = array<i64: 8, 1>}, {transform_indices = @transform_7, window_bounds = array<i64: 64, 16>}, {transform_indices = @transform_8, window_bounds = array<i64: 64, 16>}, {transform_indices = @transform_9, window_bounds = array<i64: 8, 128>}]} {
    %0 = tpu.iota {dimensions = array<i32: 0>} : vector<8x128xi32>
    %1 = tpu.iota {dimensions = array<i32: 1>} : vector<8x128xi32>
    %c0_i32 = arith.constant 0 : i32
    %2 = arith.cmpi eq, %arg1, %c0_i32 : i32
    %3 = arith.extui %2 : i1 to i32
    %c0_i32_0 = arith.constant 0 : i32
    %4 = arith.cmpi ne, %3, %c0_i32_0 : i32
    scf.if %4 {
      %cst_25 = arith.constant 0.000000e+00 : f32
      %67 = vector.broadcast %cst_25 : f32 to vector<8x128xf32>
      %c0_26 = arith.constant 0 : index
      %c0_27 = arith.constant 0 : index
      %68 = vector.load %arg12[%c0_26, %c0_27] : memref<8x128xf32, #tpu.memory_space<vmem>>, vector<8x128xf32>
      tpu.vector_store %arg12[%c0_26, %c0_27], %67 {strides = array<i32>} : memref<8x128xf32, #tpu.memory_space<vmem>>, vector<8x128xf32>,
    } else {
    }
    %c0_i32_1 = arith.constant 0 : i32
    %5 = arith.cmpi eq, %arg1, %c0_i32_1 : i32
    %c0_i32_2 = arith.constant 0 : i32
    %6 = arith.cmpi eq, %arg0, %c0_i32_2 : i32
    %7 = arith.andi %5, %6 : i1
    %8 = arith.extui %7 : i1 to i32
    %c0_i32_3 = arith.constant 0 : i32
    %9 = arith.cmpi ne, %8, %c0_i32_3 : i32
    scf.if %9 {
      %c0_25 = arith.constant 0 : index
      %c0_26 = arith.constant 0 : index
      %67 = vector.load %arg7[%c0_25, %c0_26] : memref<8x1xi32, #tpu.memory_space<vmem>>, vector<8x1xi32>
      %68 = tpu.iota {dimensions = array<i32: 1>} : vector<8x4xi32>
      %69 = vector.broadcast %67 : vector<8x1xi32> to vector<8x4xi32>
      %70 = arith.cmpi eq, %68, %69 : vector<8x4xi32>
      %71 = arith.extui %70 : vector<8x4xi1> to vector<8x4xi32>
      %72 = arith.sitofp %71 : vector<8x4xi32> to vector<8x4xf32>
      %c0_27 = arith.constant 0 : index
      %c0_28 = arith.constant 0 : index
      %73 = vector.load %arg5[%c0_27, %c0_28] : memref<8x4xf32, #tpu.memory_space<vmem>>, vector<8x4xf32>
      %cst_29 = arith.constant dense<0xFF800000> : vector<8xf32>
      %74 = vector.multi_reduction <maximumf>, %73, %cst_29 [1] : vector<8x4xf32> to vector<8xf32>
      %75 = vector.shape_cast %74 : vector<8xf32> to vector<8x1xf32>
      %76 = vector.broadcast %75 : vector<8x1xf32> to vector<8x4xf32>
      %77 = arith.subf %73, %76 : vector<8x4xf32>
      %78 = math.exp %77 : vector<8x4xf32>
      %cst_30 = arith.constant dense<0.000000e+00> : vector<8xf32>
      %79 = vector.multi_reduction <add>, %78, %cst_30 [1] : vector<8x4xf32> to vector<8xf32>
      %80 = vector.shape_cast %79 : vector<8xf32> to vector<8x1xf32>
      %81 = math.log %80 : vector<8x1xf32>
      %82 = vector.broadcast %81 : vector<8x1xf32> to vector<8x4xf32>
      %83 = arith.subf %77, %82 : vector<8x4xf32>
      %84 = arith.mulf %83, %72 : vector<8x4xf32>
      %85 = vector.shape_cast %84 : vector<8x4xf32> to vector<1x8x4xf32>
      %cst_31 = arith.constant dense<0.000000e+00> : vector<1xf32>
      %86 = vector.multi_reduction <add>, %85, %cst_31 [1, 2] : vector<1x8x4xf32> to vector<1xf32>
      %87 = vector.shape_cast %86 : vector<1xf32> to vector<1x1x1xf32>
      %88 = vector.extract %87[0, 0, 0] : f32 from vector<1x1x1xf32>
      %cst_32 = arith.constant 0.000000e+00 : f32
      %89 = arith.subf %cst_32, %88 : f32
      %cst_33 = arith.constant 8.000000e+00 : f32
      %90 = arith.divf %89, %cst_33 : f32
      %c0_34 = arith.constant 0 : index
      %c0_35 = arith.constant 0 : index
      %91 = vector.load %arg4[%c0_34, %c0_35] : memref<8x4xf32, #tpu.memory_space<vmem>>, vector<8x4xf32>
      %cst_36 = arith.constant dense<0xFF800000> : vector<8xf32>
      %92 = vector.multi_reduction <maximumf>, %91, %cst_36 [1] : vector<8x4xf32> to vector<8xf32>
      %93 = vector.shape_cast %92 : vector<8xf32> to vector<8x1xf32>
      %94 = vector.broadcast %93 : vector<8x1xf32> to vector<8x4xf32>
      %95 = arith.subf %91, %94 : vector<8x4xf32>
      %96 = math.exp %95 : vector<8x4xf32>
      %cst_37 = arith.constant dense<0.000000e+00> : vector<8xf32>
      %97 = vector.multi_reduction <add>, %96, %cst_37 [1] : vector<8x4xf32> to vector<8xf32>
      %98 = vector.shape_cast %97 : vector<8xf32> to vector<8x1xf32>
      %99 = math.log %98 : vector<8x1xf32>
      %100 = vector.broadcast %99 : vector<8x1xf32> to vector<8x4xf32>
      %101 = arith.subf %95, %100 : vector<8x4xf32>
      %102 = arith.mulf %101, %72 : vector<8x4xf32>
      %103 = vector.shape_cast %102 : vector<8x4xf32> to vector<1x8x4xf32>
      %cst_38 = arith.constant dense<0.000000e+00> : vector<1xf32>
      %104 = vector.multi_reduction <add>, %103, %cst_38 [1, 2] : vector<1x8x4xf32> to vector<1xf32>
      %105 = vector.shape_cast %104 : vector<1xf32> to vector<1x1x1xf32>
      %106 = vector.extract %105[0, 0, 0] : f32 from vector<1x1x1xf32>
      %cst_39 = arith.constant 0.000000e+00 : f32
      %107 = arith.subf %cst_39, %106 : f32
      %cst_40 = arith.constant 8.000000e+00 : f32
      %108 = arith.divf %107, %cst_40 : f32
      %c0_41 = arith.constant 0 : index
      %c0_42 = arith.constant 0 : index
      %109 = vector.load %arg6[%c0_41, %c0_42] : memref<8x8xf32, #tpu.memory_space<vmem>>, vector<8x8xf32>
      %cst_43 = arith.constant dense<0xFF800000> : vector<8xf32>
      %110 = vector.multi_reduction <maximumf>, %109, %cst_43 [1] : vector<8x8xf32> to vector<8xf32>
      %111 = vector.shape_cast %110 : vector<8xf32> to vector<8x1xf32>
      %112 = vector.broadcast %111 : vector<8x1xf32> to vector<8x8xf32>
      %113 = arith.subf %109, %112 : vector<8x8xf32>
      %114 = math.exp %113 : vector<8x8xf32>
      %cst_44 = arith.constant dense<0.000000e+00> : vector<8xf32>
      %115 = vector.multi_reduction <add>, %114, %cst_44 [1] : vector<8x8xf32> to vector<8xf32>
      %116 = vector.shape_cast %115 : vector<8xf32> to vector<8x1xf32>
      %117 = math.log %116 : vector<8x1xf32>
      %118 = vector.broadcast %117 : vector<8x1xf32> to vector<8x8xf32>
      %119 = arith.subf %113, %118 : vector<8x8xf32>
      %120 = math.exp %119 : vector<8x8xf32>
      %c0_45 = arith.constant 0 : index
      %c0_46 = arith.constant 0 : index
      %121 = vector.load %arg2[%c0_45, %c0_46] : memref<8x8xf32, #tpu.memory_space<vmem>>, vector<8x8xf32>
      %cst_47 = arith.constant dense<0xFF800000> : vector<8xf32>
      %122 = vector.multi_reduction <maximumf>, %121, %cst_47 [1] : vector<8x8xf32> to vector<8xf32>
      %123 = vector.shape_cast %122 : vector<8xf32> to vector<8x1xf32>
      %124 = vector.broadcast %123 : vector<8x1xf32> to vector<8x8xf32>
      %125 = arith.subf %121, %124 : vector<8x8xf32>
      %126 = math.exp %125 : vector<8x8xf32>
      %cst_48 = arith.constant dense<0.000000e+00> : vector<8xf32>
      %127 = vector.multi_reduction <add>, %126, %cst_48 [1] : vector<8x8xf32> to vector<8xf32>
      %128 = vector.shape_cast %127 : vector<8xf32> to vector<8x1xf32>
      %129 = math.log %128 : vector<8x1xf32>
      %130 = vector.broadcast %129 : vector<8x1xf32> to vector<8x8xf32>
      %131 = arith.subf %125, %130 : vector<8x8xf32>
      %132 = arith.subf %119, %131 : vector<8x8xf32>
      %133 = arith.mulf %120, %132 : vector<8x8xf32>
      %134 = vector.shape_cast %133 : vector<8x8xf32> to vector<1x8x8xf32>
      %cst_49 = arith.constant dense<0.000000e+00> : vector<1xf32>
      %135 = vector.multi_reduction <add>, %134, %cst_49 [1, 2] : vector<1x8x8xf32> to vector<1xf32>
      %136 = vector.shape_cast %135 : vector<1xf32> to vector<1x1x1xf32>
      %137 = vector.extract %136[0, 0, 0] : f32 from vector<1x1x1xf32>
      %cst_50 = arith.constant 8.000000e+00 : f32
      %138 = arith.divf %137, %cst_50 : f32
      %c0_51 = arith.constant 0 : index
      %c0_52 = arith.constant 0 : index
      %139 = vector.load %arg3[%c0_51, %c0_52] : memref<8x9xf32, #tpu.memory_space<vmem>>, vector<8x9xf32>
      %140 = vector.extract_strided_slice %139 {offsets = [0, 0], sizes = [8, 8], strides = [1, 1]} : vector<8x9xf32> to vector<8x8xf32>
      %c0_53 = arith.constant 0 : index
      %c0_54 = arith.constant 0 : index
      %141 = vector.load %arg8[%c0_53, %c0_54] : memref<8x1xi32, #tpu.memory_space<vmem>>, vector<8x1xi32>
      %142 = tpu.iota {dimensions = array<i32: 1>} : vector<8x8xi32>
      %143 = vector.broadcast %141 : vector<8x1xi32> to vector<8x8xi32>
      %144 = arith.cmpi eq, %142, %143 : vector<8x8xi32>
      %145 = arith.extui %144 : vector<8x8xi1> to vector<8x8xi32>
      %146 = arith.sitofp %145 : vector<8x8xi32> to vector<8x8xf32>
      %cst_55 = arith.constant dense<0.000000e+00> : vector<8x9xf32>
      %147 = tpu.matmul %146, %139, %cst_55 {dimension_numbers = #tpu.dot_dimension_numbers<[0], [0], [1], [1], [0, 1, 1, 1], [], []>} : vector<8x8xf32>, vector<8x9xf32>, vector<8x9xf32> -> vector<8x9xf32>
      %148 = vector.extract_strided_slice %147 {offsets = [0, 0], sizes = [8, 8], strides = [1, 1]} : vector<8x9xf32> to vector<8x8xf32>
      %149 = vector.extract_strided_slice %147 {offsets = [0, 8], sizes = [8, 1], strides = [1, 1]} : vector<8x9xf32> to vector<8x1xf32>
      %cst_56 = arith.constant 1.000000e+00 : f32
      %150 = vector.broadcast %cst_56 : f32 to vector<8x1xf32>
      %151 = arith.maximumf %149, %150 : vector<8x1xf32>
      %152 = vector.broadcast %151 : vector<8x1xf32> to vector<8x8xf32>
      %153 = arith.divf %148, %152 : vector<8x8xf32>
      %cst_57 = arith.constant dense<0xFF800000> : vector<8xf32>
      %154 = vector.multi_reduction <maximumf>, %153, %cst_57 [1] : vector<8x8xf32> to vector<8xf32>
      %155 = vector.shape_cast %154 : vector<8xf32> to vector<8x1xf32>
      %156 = vector.broadcast %155 : vector<8x1xf32> to vector<8x8xf32>
      %157 = arith.subf %153, %156 : vector<8x8xf32>
      %158 = math.exp %157 : vector<8x8xf32>
      %cst_58 = arith.constant dense<0.000000e+00> : vector<8xf32>
      %159 = vector.multi_reduction <add>, %158, %cst_58 [1] : vector<8x8xf32> to vector<8xf32>
      %160 = vector.shape_cast %159 : vector<8xf32> to vector<8x1xf32>
      %161 = vector.broadcast %160 : vector<8x1xf32> to vector<8x8xf32>
      %162 = arith.divf %158, %161 : vector<8x8xf32>
      %163 = vector.extract_strided_slice %162 {offsets = [0, 0], sizes = [4, 8], strides = [1, 1]} : vector<8x8xf32> to vector<4x8xf32>
      %cst_59 = arith.constant dense<0.000000e+00> : vector<8xf32>
      %164 = vector.multi_reduction <add>, %163, %cst_59 [0] : vector<4x8xf32> to vector<8xf32>
      %165 = vector.shape_cast %164 : vector<8xf32> to vector<1x8xf32>
      %cst_60 = arith.constant 4.000000e+00 : f32
      %166 = vector.broadcast %cst_60 : f32 to vector<1x8xf32>
      %167 = arith.divf %165, %166 : vector<1x8xf32>
      %168 = vector.extract_strided_slice %162 {offsets = [4, 0], sizes = [4, 8], strides = [1, 1]} : vector<8x8xf32> to vector<4x8xf32>
      %cst_61 = arith.constant dense<0.000000e+00> : vector<8xf32>
      %169 = vector.multi_reduction <add>, %168, %cst_61 [0] : vector<4x8xf32> to vector<8xf32>
      %170 = vector.shape_cast %169 : vector<8xf32> to vector<1x8xf32>
      %cst_62 = arith.constant 4.000000e+00 : f32
      %171 = vector.broadcast %cst_62 : f32 to vector<1x8xf32>
      %172 = arith.divf %170, %171 : vector<1x8xf32>
      %173 = vector.extract_strided_slice %140 {offsets = [0, 0], sizes = [4, 8], strides = [1, 1]} : vector<8x8xf32> to vector<4x8xf32>
      %cst_63 = arith.constant dense<0xFF800000> : vector<4xf32>
      %174 = vector.multi_reduction <maximumf>, %173, %cst_63 [1] : vector<4x8xf32> to vector<4xf32>
      %175 = vector.shape_cast %174 : vector<4xf32> to vector<4x1xf32>
      %176 = vector.broadcast %175 : vector<4x1xf32> to vector<4x8xf32>
      %177 = arith.subf %173, %176 : vector<4x8xf32>
      %178 = math.exp %177 : vector<4x8xf32>
      %cst_64 = arith.constant dense<0.000000e+00> : vector<4xf32>
      %179 = vector.multi_reduction <add>, %178, %cst_64 [1] : vector<4x8xf32> to vector<4xf32>
      %180 = vector.shape_cast %179 : vector<4xf32> to vector<4x1xf32>
      %181 = math.log %180 : vector<4x1xf32>
      %182 = vector.broadcast %181 : vector<4x1xf32> to vector<4x8xf32>
      %183 = arith.subf %177, %182 : vector<4x8xf32>
      %cst_65 = arith.constant dense<0.000000e+00> : vector<8xf32>
      %184 = vector.multi_reduction <add>, %183, %cst_65 [0] : vector<4x8xf32> to vector<8xf32>
      %185 = vector.shape_cast %184 : vector<8xf32> to vector<1x8xf32>
      %186 = vector.extract_strided_slice %140 {offsets = [4, 0], sizes = [4, 8], strides = [1, 1]} : vector<8x8xf32> to vector<4x8xf32>
      %cst_66 = arith.constant dense<0xFF800000> : vector<4xf32>
      %187 = vector.multi_reduction <maximumf>, %186, %cst_66 [1] : vector<4x8xf32> to vector<4xf32>
      %188 = vector.shape_cast %187 : vector<4xf32> to vector<4x1xf32>
      %189 = vector.broadcast %188 : vector<4x1xf32> to vector<4x8xf32>
      %190 = arith.subf %186, %189 : vector<4x8xf32>
      %191 = math.exp %190 : vector<4x8xf32>
      %cst_67 = arith.constant dense<0.000000e+00> : vector<4xf32>
      %192 = vector.multi_reduction <add>, %191, %cst_67 [1] : vector<4x8xf32> to vector<4xf32>
      %193 = vector.shape_cast %192 : vector<4xf32> to vector<4x1xf32>
      %194 = math.log %193 : vector<4x1xf32>
      %195 = vector.broadcast %194 : vector<4x1xf32> to vector<4x8xf32>
      %196 = arith.subf %190, %195 : vector<4x8xf32>
      %cst_68 = arith.constant dense<0.000000e+00> : vector<8xf32>
      %197 = vector.multi_reduction <add>, %196, %cst_68 [0] : vector<4x8xf32> to vector<8xf32>
      %198 = vector.shape_cast %197 : vector<8xf32> to vector<1x8xf32>
      %199 = math.log %167 : vector<1x8xf32>
      %200 = arith.mulf %167, %199 : vector<1x8xf32>
      %201 = vector.shape_cast %200 : vector<1x8xf32> to vector<1x1x8xf32>
      %cst_69 = arith.constant dense<0.000000e+00> : vector<1xf32>
      %202 = vector.multi_reduction <add>, %201, %cst_69 [1, 2] : vector<1x1x8xf32> to vector<1xf32>
      %203 = vector.shape_cast %202 : vector<1xf32> to vector<1x1x1xf32>
      %204 = vector.extract %203[0, 0, 0] : f32 from vector<1x1x1xf32>
      %205 = math.log %172 : vector<1x8xf32>
      %206 = arith.mulf %172, %205 : vector<1x8xf32>
      %207 = vector.shape_cast %206 : vector<1x8xf32> to vector<1x1x8xf32>
      %cst_70 = arith.constant dense<0.000000e+00> : vector<1xf32>
      %208 = vector.multi_reduction <add>, %207, %cst_70 [1, 2] : vector<1x1x8xf32> to vector<1xf32>
      %209 = vector.shape_cast %208 : vector<1xf32> to vector<1x1x1xf32>
      %210 = vector.extract %209[0, 0, 0] : f32 from vector<1x1x1xf32>
      %211 = arith.mulf %167, %185 : vector<1x8xf32>
      %212 = vector.shape_cast %211 : vector<1x8xf32> to vector<1x1x8xf32>
      %cst_71 = arith.constant dense<0.000000e+00> : vector<1xf32>
      %213 = vector.multi_reduction <add>, %212, %cst_71 [1, 2] : vector<1x1x8xf32> to vector<1xf32>
      %214 = vector.shape_cast %213 : vector<1xf32> to vector<1x1x1xf32>
      %215 = vector.extract %214[0, 0, 0] : f32 from vector<1x1x1xf32>
      %cst_72 = arith.constant 2.500000e-01 : f32
      %216 = arith.mulf %cst_72, %215 : f32
      %217 = arith.subf %204, %216 : f32
      %218 = arith.mulf %172, %185 : vector<1x8xf32>
      %219 = vector.shape_cast %218 : vector<1x8xf32> to vector<1x1x8xf32>
      %cst_73 = arith.constant dense<0.000000e+00> : vector<1xf32>
      %220 = vector.multi_reduction <add>, %219, %cst_73 [1, 2] : vector<1x1x8xf32> to vector<1xf32>
      %221 = vector.shape_cast %220 : vector<1xf32> to vector<1x1x1xf32>
      %222 = vector.extract %221[0, 0, 0] : f32 from vector<1x1x1xf32>
      %cst_74 = arith.constant 2.500000e-01 : f32
      %223 = arith.mulf %cst_74, %222 : f32
      %224 = arith.subf %210, %223 : f32
      %225 = arith.mulf %172, %198 : vector<1x8xf32>
      %226 = vector.shape_cast %225 : vector<1x8xf32> to vector<1x1x8xf32>
      %cst_75 = arith.constant dense<0.000000e+00> : vector<1xf32>
      %227 = vector.multi_reduction <add>, %226, %cst_75 [1, 2] : vector<1x1x8xf32> to vector<1xf32>
      %228 = vector.shape_cast %227 : vector<1xf32> to vector<1x1x1xf32>
      %229 = vector.extract %228[0, 0, 0] : f32 from vector<1x1x1xf32>
      %cst_76 = arith.constant 2.500000e-01 : f32
      %230 = arith.mulf %cst_76, %229 : f32
      %231 = arith.subf %210, %230 : f32
      %232 = arith.mulf %167, %198 : vector<1x8xf32>
      %233 = vector.shape_cast %232 : vector<1x8xf32> to vector<1x1x8xf32>
      %cst_77 = arith.constant dense<0.000000e+00> : vector<1xf32>
      %234 = vector.multi_reduction <add>, %233, %cst_77 [1, 2] : vector<1x1x8xf32> to vector<1xf32>
      %235 = vector.shape_cast %234 : vector<1xf32> to vector<1x1x1xf32>
      %236 = vector.extract %235[0, 0, 0] : f32 from vector<1x1x1xf32>
      %cst_78 = arith.constant 2.500000e-01 : f32
      %237 = arith.mulf %cst_78, %236 : f32
      %238 = arith.subf %204, %237 : f32
      %cst_79 = arith.constant 5.000000e-01 : f32
      %239 = arith.addf %cst_79, %217 : f32
      %240 = arith.subf %239, %224 : f32
      %cst_80 = arith.constant 0.000000e+00 : f32
      %241 = arith.maximumf %240, %cst_80 : f32
      %cst_81 = arith.constant 5.000000e-01 : f32
      %242 = arith.addf %cst_81, %231 : f32
      %243 = arith.subf %242, %238 : f32
      %cst_82 = arith.constant 0.000000e+00 : f32
      %244 = arith.maximumf %243, %cst_82 : f32
      %245 = arith.addf %241, %244 : f32
      %c0_83 = arith.constant 0 : index
      %c0_84 = arith.constant 0 : index
      %246 = vector.load %arg12[%c0_83, %c0_84] : memref<8x128xf32, #tpu.memory_space<vmem>>, vector<8x128xf32>
      %c0_i32_85 = arith.constant 0 : i32
      %247 = vector.broadcast %c0_i32_85 : i32 to vector<8x128xi32>
      %248 = arith.cmpi eq, %0, %247 : vector<8x128xi32>
      %c2_i32 = arith.constant 2 : i32
      %249 = vector.broadcast %c2_i32 : i32 to vector<8x128xi32>
      %250 = arith.cmpi eq, %1, %249 : vector<8x128xi32>
      %251 = arith.andi %248, %250 : vector<8x128xi1>
      %252 = arith.extui %251 : vector<8x128xi1> to vector<8x128xi32>
      %253 = arith.sitofp %252 : vector<8x128xi32> to vector<8x128xf32>
      %254 = vector.broadcast %138 : f32 to vector<8x128xf32>
      %255 = arith.mulf %253, %254 : vector<8x128xf32>
      %c0_i32_86 = arith.constant 0 : i32
      %256 = vector.broadcast %c0_i32_86 : i32 to vector<8x128xi32>
      %257 = arith.cmpi eq, %0, %256 : vector<8x128xi32>
      %c3_i32 = arith.constant 3 : i32
      %258 = vector.broadcast %c3_i32 : i32 to vector<8x128xi32>
      %259 = arith.cmpi eq, %1, %258 : vector<8x128xi32>
      %260 = arith.andi %257, %259 : vector<8x128xi1>
      %261 = arith.extui %260 : vector<8x128xi1> to vector<8x128xi32>
      %262 = arith.sitofp %261 : vector<8x128xi32> to vector<8x128xf32>
      %263 = vector.broadcast %245 : f32 to vector<8x128xf32>
      %264 = arith.mulf %262, %263 : vector<8x128xf32>
      %265 = arith.addf %255, %264 : vector<8x128xf32>
      %c0_i32_87 = arith.constant 0 : i32
      %266 = vector.broadcast %c0_i32_87 : i32 to vector<8x128xi32>
      %267 = arith.cmpi eq, %0, %266 : vector<8x128xi32>
      %c4_i32 = arith.constant 4 : i32
      %268 = vector.broadcast %c4_i32 : i32 to vector<8x128xi32>
      %269 = arith.cmpi eq, %1, %268 : vector<8x128xi32>
      %270 = arith.andi %267, %269 : vector<8x128xi1>
      %271 = arith.extui %270 : vector<8x128xi1> to vector<8x128xi32>
      %272 = arith.sitofp %271 : vector<8x128xi32> to vector<8x128xf32>
      %273 = vector.broadcast %108 : f32 to vector<8x128xf32>
      %274 = arith.mulf %272, %273 : vector<8x128xf32>
      %275 = arith.addf %265, %274 : vector<8x128xf32>
      %c0_i32_88 = arith.constant 0 : i32
      %276 = vector.broadcast %c0_i32_88 : i32 to vector<8x128xi32>
      %277 = arith.cmpi eq, %0, %276 : vector<8x128xi32>
      %c5_i32 = arith.constant 5 : i32
      %278 = vector.broadcast %c5_i32 : i32 to vector<8x128xi32>
      %279 = arith.cmpi eq, %1, %278 : vector<8x128xi32>
      %280 = arith.andi %277, %279 : vector<8x128xi1>
      %281 = arith.extui %280 : vector<8x128xi1> to vector<8x128xi32>
      %282 = arith.sitofp %281 : vector<8x128xi32> to vector<8x128xf32>
      %283 = vector.broadcast %90 : f32 to vector<8x128xf32>
      %284 = arith.mulf %282, %283 : vector<8x128xf32>
      %285 = arith.addf %275, %284 : vector<8x128xf32>
      %286 = arith.addf %246, %285 : vector<8x128xf32>
      %c0_89 = arith.constant 0 : index
      %c0_90 = arith.constant 0 : index
      %287 = vector.load %arg12[%c0_89, %c0_90] : memref<8x128xf32, #tpu.memory_space<vmem>>, vector<8x128xf32>
      tpu.vector_store %arg12[%c0_89, %c0_90], %286 {strides = array<i32>} : memref<8x128xf32, #tpu.memory_space<vmem>>, vector<8x128xf32>,
    } else {
    }
    %c1_i32 = arith.constant 1 : i32
    %10 = arith.muli %arg0, %c1_i32 : i32
    %11 = arith.addi %10, %arg1 : i32
    %12 = tpu.iota {dimensions = array<i32: 0>} : vector<64x1xi32>
    %c64_i32 = arith.constant 64 : i32
    %13 = arith.muli %11, %c64_i32 : i32
    %14 = vector.broadcast %13 : i32 to vector<64x1xi32>
    %15 = arith.addi %12, %14 : vector<64x1xi32>
    %c64_i32_4 = arith.constant 64 : i32
    %16 = vector.broadcast %c64_i32_4 : i32 to vector<64x1xi32>
    %17 = arith.cmpi slt, %15, %16 : vector<64x1xi32>
    %c0 = arith.constant 0 : index
    %c0_5 = arith.constant 0 : index
    %18 = vector.load %arg9[%c0, %c0_5] : memref<64x16xf32, #tpu.memory_space<vmem>>, vector<64x16xf32>
    %c0_6 = arith.constant 0 : index
    %c0_7 = arith.constant 0 : index
    %19 = vector.load %arg10[%c0_6, %c0_7] : memref<64x16xf32, #tpu.memory_space<vmem>>, vector<64x16xf32>
    %cst = arith.constant dense<0.000000e+00> : vector<64xf32>
    %20 = vector.multi_reduction <add>, %18, %cst [1] : vector<64x16xf32> to vector<64xf32>
    %21 = vector.shape_cast %20 : vector<64xf32> to vector<64x1xf32>
    %cst_8 = arith.constant 0.000000e+00 : f32
    %22 = vector.broadcast %cst_8 : f32 to vector<64x1xf32>
    %23 = arith.cmpf one, %21, %22 : vector<64x1xf32>
    %24 = arith.andi %17, %23 : vector<64x1xi1>
    %25 = arith.subf %19, %18 : vector<64x16xf32>
    %26 = math.absf %25 : vector<64x16xf32>
    %cst_9 = arith.constant dense<0.000000e+00> : vector<64xf32>
    %27 = vector.multi_reduction <add>, %26, %cst_9 [1] : vector<64x16xf32> to vector<64xf32>
    %28 = vector.shape_cast %27 : vector<64xf32> to vector<64x1xf32>
    %cst_10 = arith.constant 0.000000e+00 : f32
    %29 = vector.broadcast %cst_10 : f32 to vector<64x1xf32>
    %30 = arith.select %24, %28, %29 : vector<64x1xi1>, vector<64x1xf32>
    %31 = vector.shape_cast %30 : vector<64x1xf32> to vector<1x64x1xf32>
    %cst_11 = arith.constant dense<0.000000e+00> : vector<1xf32>
    %32 = vector.multi_reduction <add>, %31, %cst_11 [1, 2] : vector<1x64x1xf32> to vector<1xf32>
    %33 = vector.shape_cast %32 : vector<1xf32> to vector<1x1x1xf32>
    %34 = vector.extract %33[0, 0, 0] : f32 from vector<1x1x1xf32>
    %cst_12 = arith.constant 1.000000e+00 : f32
    %cst_13 = arith.constant 0.000000e+00 : f32
    %35 = vector.broadcast %cst_12 : f32 to vector<64x1xf32>
    %36 = vector.broadcast %cst_13 : f32 to vector<64x1xf32>
    %37 = arith.select %24, %35, %36 : vector<64x1xi1>, vector<64x1xf32>
    %38 = vector.shape_cast %37 : vector<64x1xf32> to vector<1x64x1xf32>
    %cst_14 = arith.constant dense<0.000000e+00> : vector<1xf32>
    %39 = vector.multi_reduction <add>, %38, %cst_14 [1, 2] : vector<1x64x1xf32> to vector<1xf32>
    %40 = vector.shape_cast %39 : vector<1xf32> to vector<1x1x1xf32>
    %41 = vector.extract %40[0, 0, 0] : f32 from vector<1x1x1xf32>
    %c0_15 = arith.constant 0 : index
    %c0_16 = arith.constant 0 : index
    %42 = vector.load %arg12[%c0_15, %c0_16] : memref<8x128xf32, #tpu.memory_space<vmem>>, vector<8x128xf32>
    %c0_i32_17 = arith.constant 0 : i32
    %43 = vector.broadcast %c0_i32_17 : i32 to vector<8x128xi32>
    %44 = arith.cmpi eq, %0, %43 : vector<8x128xi32>
    %c0_i32_18 = arith.constant 0 : i32
    %45 = vector.broadcast %c0_i32_18 : i32 to vector<8x128xi32>
    %46 = arith.cmpi eq, %1, %45 : vector<8x128xi32>
    %47 = arith.andi %44, %46 : vector<8x128xi1>
    %48 = arith.extui %47 : vector<8x128xi1> to vector<8x128xi32>
    %49 = arith.sitofp %48 : vector<8x128xi32> to vector<8x128xf32>
    %50 = vector.broadcast %34 : f32 to vector<8x128xf32>
    %51 = arith.mulf %49, %50 : vector<8x128xf32>
    %c0_i32_19 = arith.constant 0 : i32
    %52 = vector.broadcast %c0_i32_19 : i32 to vector<8x128xi32>
    %53 = arith.cmpi eq, %0, %52 : vector<8x128xi32>
    %c1_i32_20 = arith.constant 1 : i32
    %54 = vector.broadcast %c1_i32_20 : i32 to vector<8x128xi32>
    %55 = arith.cmpi eq, %1, %54 : vector<8x128xi32>
    %56 = arith.andi %53, %55 : vector<8x128xi1>
    %57 = arith.extui %56 : vector<8x128xi1> to vector<8x128xi32>
    %58 = arith.sitofp %57 : vector<8x128xi32> to vector<8x128xf32>
    %59 = vector.broadcast %41 : f32 to vector<8x128xf32>
    %60 = arith.mulf %58, %59 : vector<8x128xf32>
    %61 = arith.addf %51, %60 : vector<8x128xf32>
    %62 = arith.addf %42, %61 : vector<8x128xf32>
    %c0_21 = arith.constant 0 : index
    %c0_22 = arith.constant 0 : index
    %63 = vector.load %arg12[%c0_21, %c0_22] : memref<8x128xf32, #tpu.memory_space<vmem>>, vector<8x128xf32>
    tpu.vector_store %arg12[%c0_21, %c0_22], %62 {strides = array<i32>} : memref<8x128xf32, #tpu.memory_space<vmem>>, vector<8x128xf32>,
    %c0_i32_23 = arith.constant 0 : i32
    %64 = arith.cmpi eq, %arg1, %c0_i32_23 : i32
    %65 = arith.extui %64 : i1 to i32
    %c0_i32_24 = arith.constant 0 : i32
    %66 = arith.cmpi ne, %65, %c0_i32_24 : i32
    scf.if %66 {
      %c0_25 = arith.constant 0 : index
      %c0_26 = arith.constant 0 : index
      %67 = vector.load %arg12[%c0_25, %c0_26] : memref<8x128xf32, #tpu.memory_space<vmem>>, vector<8x128xf32>
      %c0_27 = arith.constant 0 : index
      %c0_28 = arith.constant 0 : index
      %68 = vector.load %arg11[%c0_27, %c0_28] : memref<8x128xf32, #tpu.memory_space<vmem>>, vector<8x128xf32>
      tpu.vector_store %arg11[%c0_27, %c0_28], %67 {strides = array<i32>} : memref<8x128xf32, #tpu.memory_space<vmem>>, vector<8x128xf32>,
    } else {
    }
    return
  }
  func.func @transform_0(%arg0: i32, %arg1: i32) -> (i32, i32) {
    %c0_i32 = arith.constant 0 : i32
    %c0_i32_0 = arith.constant 0 : i32
    %c0_i32_1 = arith.constant 0 : i32
    return %c0_i32, %c0_i32_0 : i32, i32
  }
  func.func @transform_1(%arg0: i32, %arg1: i32) -> (i32, i32) {
    %c0_i32 = arith.constant 0 : i32
    %c0_i32_0 = arith.constant 0 : i32
    %c0_i32_1 = arith.constant 0 : i32
    return %c0_i32, %c0_i32_0 : i32, i32
  }
  func.func @transform_2(%arg0: i32, %arg1: i32) -> (i32, i32) {
    %c0_i32 = arith.constant 0 : i32
    %c0_i32_0 = arith.constant 0 : i32
    %c0_i32_1 = arith.constant 0 : i32
    return %c0_i32, %c0_i32_0 : i32, i32
  }
  func.func @transform_3(%arg0: i32, %arg1: i32) -> (i32, i32) {
    %c0_i32 = arith.constant 0 : i32
    %c0_i32_0 = arith.constant 0 : i32
    %c0_i32_1 = arith.constant 0 : i32
    return %c0_i32, %c0_i32_0 : i32, i32
  }
  func.func @transform_4(%arg0: i32, %arg1: i32) -> (i32, i32) {
    %c0_i32 = arith.constant 0 : i32
    %c0_i32_0 = arith.constant 0 : i32
    %c0_i32_1 = arith.constant 0 : i32
    return %c0_i32, %c0_i32_0 : i32, i32
  }
  func.func @transform_5(%arg0: i32, %arg1: i32) -> (i32, i32) {
    %c0_i32 = arith.constant 0 : i32
    %c0_i32_0 = arith.constant 0 : i32
    %c0_i32_1 = arith.constant 0 : i32
    return %c0_i32, %c0_i32_0 : i32, i32
  }
  func.func @transform_6(%arg0: i32, %arg1: i32) -> (i32, i32) {
    %c0_i32 = arith.constant 0 : i32
    %c0_i32_0 = arith.constant 0 : i32
    %c0_i32_1 = arith.constant 0 : i32
    return %c0_i32, %c0_i32_0 : i32, i32
  }
  func.func @transform_7(%arg0: i32, %arg1: i32) -> (i32, i32) {
    %c1_i32 = arith.constant 1 : i32
    %0 = arith.muli %arg0, %c1_i32 : i32
    %1 = arith.addi %0, %arg1 : i32
    %c0_i32 = arith.constant 0 : i32
    %2 = arith.minsi %1, %c0_i32 : i32
    %c0_i32_0 = arith.constant 0 : i32
    %c0_i32_1 = arith.constant 0 : i32
    return %2, %c0_i32_0 : i32, i32
  }
  func.func @transform_8(%arg0: i32, %arg1: i32) -> (i32, i32) {
    %c1_i32 = arith.constant 1 : i32
    %0 = arith.muli %arg0, %c1_i32 : i32
    %1 = arith.addi %0, %arg1 : i32
    %c0_i32 = arith.constant 0 : i32
    %2 = arith.minsi %1, %c0_i32 : i32
    %c0_i32_0 = arith.constant 0 : i32
    %c0_i32_1 = arith.constant 0 : i32
    return %2, %c0_i32_0 : i32, i32
  }
  func.func @transform_9(%arg0: i32, %arg1: i32) -> (i32, i32) {
    %c0_i32 = arith.constant 0 : i32
    %c0_i32_0 = arith.constant 0 : i32
    return %c0_i32, %arg0 : i32, i32
  }
}

</mosaic_0001>

<bundles_post_ra>
// kernel: tpu_custom_call.1
= control target key start
LH: loop header
LB: loop body
LE: loop exit
PB: predicated region body
PF: predicated region fallthrough
CT: control target
= control target key end

     0   :  { %s1209_s0 = inlined_call_operand.vmem [shape: f32[8,8], index: 0, kind: input, shape index: {}]   ;;  %s1210_s1 = inlined_call_operand.vmem [shape: f32[8,9], index: 1, kind: input, shape index: {}]   ;;  %s1211_s2 = inlined_call_operand.vmem [shape: f32[8,4], index: 2, kind: input, shape index: {}]   ;;  %s1212_s3 = inlined_call_operand.vmem [shape: f32[8,4], index: 3, kind: input, shape index: {}]   ;;  %s1213_s4 = inlined_call_operand.vmem [shape: f32[8,8], index: 4, kind: input, shape index: {}]   ;;  %s1214_s5 = inlined_call_operand.vmem [shape: s32[8,1], index: 5, kind: input, shape index: {}]   ;;  %s1215_s6 = inlined_call_operand.vmem [shape: s32[8,1], index: 6, kind: input, shape index: {}]   ;;  %s1216_s7 = inlined_call_operand.vmem [shape: f32[64,16], index: 7, kind: input, shape index: {}]   ;;  %s1217_s8 = inlined_call_operand.vmem [shape: f32[64,16], index: 8, kind: input, shape index: {}]   ;;  %s1218_s9 = inlined_call_operand.hbm [shape: f32[8,128], index: 9, kind: output, shape index: {}]  }
   0x1   :  { %v238_v0 = vld [vmem:[%s1215_s6] sm:$0xff] }
   0x2   :  { %14 = vsyncpa [#allocation4], 0  ;;  %v879_v1 = vmov 0   ;;  %v942_v2 = vld [vmem:[%s1210_s1] sm:$0xff]  ;;  %v97_v3 = vlaneseq  ;;  %v880_v6 = vmov 0.0   ;;  %vm391_vm1 = vcmask 64516  }
   0x3   :  { %809 = vset.pattern.permute.xlu0 %v879_v1  ;;  %811 = vset.pattern.permute.xlu2 %v879_v1  ;;  %v392_v8 = vsel %vm391_vm1, %v942_v2, -inf  ;;  %vm345_vm2 = vcmask 60416   ;;  %v187_v10 = vld [vmem:[%s1213_s4] sm:$0xff]  ;;  %vm188_vm3 = vcmask 64512   ;;  %vm119_vm4 = vcmask 31744   ;;  %v558_v58 = vld [vmem:[%s1216_s7 + $0x8] sm:$0xff] }
   0x4   :  { %240 = vperm.xlu0 %809, %v238_v0   ;;  %295 = vmatpush.msra.mxu0 %v942_v2  ;;  %v946_v4 = vand.u32 127, %v97_v3  ;;  %v372_v9 = vsel %vm345_vm2, %v942_v2, -inf  ;;  %v189_v11 = vsel %vm188_vm3, %v187_v10, -inf  ;;  %v203_v12 = vld [vmem:[%s1209_s0] sm:$0xff]  ;;  %v881_v17 = vmov 8   ;;  %v566_v59 = vld [vmem:[%s1217_s8 + $0x8] sm:$0xff] }
   0x5   :  { %393 = vmax.xlane.f32.xlu2 %v392_v8  ;;  %v204_v13 = vsel %vm188_vm3, %v203_v12, -inf  ;;  %v118_v14 = vld [vmem:[%s1212_s3] sm:$0xff]  ;;  %810 = vset.pattern.permute.xlu1 %v881_v17  ;;  %v615_v62 = vsub.f32 %v566_v59, %v558_v58  ;;  %vm573_vm9 = vcmask 130048   ;;  %vm662_vm12 = vcmask 7168   ;;  %s884_s3 = smov 0.0  }
   0x6   :  { %v120_v16 = vsel %vm119_vm4, %v118_v14, -inf  ;;  %v153_v18 = vld [vmem:[%s1211_s2] sm:$0xff] }
   0x7   :  { %v154_v20 = vsel %vm119_vm4, %v153_v18, -inf  ;;  %v111_v39 = vld [vmem:[%s1214_s5] sm:$0xff]  ;;  %v623_v1 = vand.u32 2147483647, %v615_v62 }
   0xd   :  { %373 = vmax.xlane.f32.xlu2 %v372_v9  ;;  %v561_v9 = vld [vmem:[%s1216_s7 + $0x20] sm:$0xff] }
   0xe   :  { %v586_v59 = vsel %vm573_vm9, %v561_v9, 0.0 }
  0x15   :  { %190 = vmax.xlane.f32.xlu2 %v189_v11 }
  0x1d   :  { %205 = vmax.xlane.f32.xlu2 %v204_v13 }
  0x25   :  { %121 = vmax.xlane.f32.xlu2 %v120_v16 }
  0x2d   :  { %155 = vmax.xlane.f32.xlu2 %v154_v20  ;;  %v557_v20 = vld [vmem:[%s1216_s7] sm:$0xff] }
  0x76   :  { %v241_v5 = vpop.permute.xlu0 %240 }
  0x77   :  { %vm242_vm0 = vcmp.eq.s32.totalorder %v946_v4, %v241_v5  ;;  %v633_v5 = vsel %vm573_vm9, %v623_v1, 0.0 }
  0x78   :  { %v770_v7 = vsel %vm242_vm0, 1.0, %v880_v6  ;;  %v394_v19 = vpop.xlane.xlu2 %393 }
  0x79   :  { %245 = vxpose.xlu0.b32.start.end [1/1] (short) (narrow) %v770_v7, 8  ;;  %v972_v21 = vsub.f32 %v942_v2, %v394_v19 }
  0x7b   :  { %v396_v22 = vmul.f32 1.442695, %v972_v21 }
  0x7d   :  { %813 = vpow2.f32 %v396_v22 }
  0x80   :  { %v374_v23 = vpop.xlane.xlu2 %373 }
  0x81   :  { %v988_v43 = vsub.f32 %v942_v2, %v374_v23  ;;  %v574_v23 = vsel %vm573_vm9, %v557_v20, 0.0 }
  0x83   :  { %v814_v24 = vpop.eup %813  ;;  %v376_v48 = vmul.f32 1.442695, %v988_v43 }
  0x84   :  { %v398_v25 = vsel %vm391_vm1, %v814_v24, 0.0 }
  0x85   :  { %399 = vadd.xlane.f32.xlu2 %v398_v25 }
  0x88   :  { %v191_v26 = vpop.xlane.xlu2 %190 }
  0x89   :  { %v976_v27 = vsub.f32 %v187_v10, %v191_v26  ;;  %v569_v10 = vld [vmem:[%s1217_s8 + $0x20] sm:$0xff]  ;;  %v563_v26 = vld [vmem:[%s1216_s7 + $0x30] sm:$0xff] }
  0x8a   :  { %v618_v11 = vsub.f32 %v569_v10, %v561_v9  ;;  %v592_v62 = vsel %vm573_vm9, %v563_v26, 0.0 }
  0x8b   :  { %v193_v28 = vmul.f32 1.442695, %v976_v27 }
  0x8c   :  { %v626_v13 = vand.u32 2147483647, %v618_v11 }
  0x8d   :  { %815 = vpow2.f32 %v193_v28  ;;  %v571_v28 = vld [vmem:[%s1217_s8 + $0x30] sm:$0xff] }
  0x90   :  { %v206_v29 = vpop.xlane.xlu2 %205 }
  0x91   :  { %v991_v52 = vsub.f32 %v203_v12, %v206_v29  ;;  %v620_v29 = vsub.f32 %v571_v28, %v563_v26 }
  0x93   :  { %v816_v30 = vpop.eup %815  ;;  %v208_v56 = vmul.f32 1.442695, %v991_v52 }
  0x94   :  { %v195_v31 = vsel %vm188_vm3, %v816_v30, 0.0  ;;  %v565_v30 = vld [vmem:[%s1217_s8] sm:$0xff] }
  0x95   :  { %196 = vadd.xlane.f32.xlu2 %v195_v31  ;;  %v628_v31 = vand.u32 2147483647, %v620_v29 }
  0x98   :  { %v122_v34 = vpop.xlane.xlu2 %121 }
  0x99   :  { %v980_v35 = vsub.f32 %v118_v14, %v122_v34  ;;  %v648_v34 = vsel %vm573_vm9, %v628_v31, 0.0 }
  0x9b   :  { %v124_v36 = vmul.f32 1.442695, %v980_v35 }
  0x9d   :  { %817 = vpow2.f32 %v124_v36 }
  0xa0   :  { %v156_v57 = vpop.xlane.xlu2 %155 }
  0xa1   :  { %v1004_v61 = vsub.f32 %v153_v18, %v156_v57  ;;  %v570_v18 = vld [vmem:[%s1217_s8 + $0x28] sm:$0xff] }
  0xa3   :  { %v818_v37 = vpop.eup %817  ;;  %v158_v0 = vmul.f32 1.442695, %v1004_v61 }
  0xa4   :  { %v126_v38 = vsel %vm119_vm4, %v818_v37, 0.0 }
  0xa5   :  { %127 = vadd.xlane.f32.xlu2 %v126_v38 }
  0xbd   :  { %113 = vperm.xlu2 %811, %v111_v39  }
  0xe0   :  { %812 = vset.pattern.permute.xlu0 %v881_v17  ;;  %v562_v17 = vld [vmem:[%s1216_s7 + $0x28] sm:$0xff] }
  0xe1   :  { %v619_v19 = vsub.f32 %v570_v18, %v562_v17 }
  0xe3   :  { %v627_v22 = vand.u32 2147483647, %v619_v19 }
  0xe5   :  { %v645_v24 = vsel %vm573_vm9, %v627_v22, 0.0 }
  0xe6   :  { %634 = vadd.xlane.f32.xlu2 %v633_v5 }
  0xf8   :  { %v1010_v8 = vpop.xlane.xlu2 %399 }
 0x108   :  { %v197_v16 = vpop.xlane.xlu2 %196 }
 0x118   :  { %v128_v25 = vpop.xlane.xlu2 %127 }
 0x11d   :  { %v261_v15 = vpop.trf.xlu0 }
 0x11e   :  { %771 = vmatmul.msk.f32.vlgmr.msra.gmra.mxu0 %vm188_vm3, %v261_v15  ;;  %v642_v15 = vsel %vm573_vm9, %v626_v13, 0.0 }
 0x11f   :  { %643 = vadd.xlane.f32.xlu2 %v642_v15 }
 0x127   :  { %646 = vadd.xlane.f32.xlu2 %v645_v24 }
 0x12f   :  { %649 = vadd.xlane.f32.xlu2 %v648_v34 }
 0x19b   :  { %v297_v32 = vpop.f32.mrf.mxu0 }
 0x19c   :  { %v300_v33 = vmax.f32 %v297_v32, 1.0 }
 0x19e   :  { %303 = vperm.xlu1 %810, %v300_v33   ;;  %v577_v33 = vsel %vm573_vm9, %v558_v58, 0.0 }
 0x210   :  { %v304_v40 = vpop.permute.xlu1 %303 }
 0x211   :  { %819 = vrcp.f32 %v304_v40  ;;  %v317_v45 = vand.u32 2147483648, %v304_v40  ;;  %v315_v47 = vand.u32 2147483647, %v304_v40  ;;  %vm311_vm6 = vweird.f32 %v304_v40 }
 0x212   :  { %821 = vpow2.f32 %v376_v48 }
 0x213   :  { %v318_v50 = vor.u32 1.1754944e-38, %v317_v45  ;;  %vm316_vm8 = vcmp.eq.f32.partialorder %v315_v47, 8.507059e+37  ;;  %823 = vpow2.f32 %v208_v56 }
 0x214   :  { %825 = vpow2.f32 %v158_v0 }
 0x215   :  { %827 = vlog2.f32 %v128_v25 }
 0x216   :  { %829 = vlog2.f32 %v197_v16 }
 0x217   :  { %v820_v41 = vpop.eup %819 }
 0x218   :  { %v307_v42 = vmul.f32 %v820_v41, %v304_v40  ;;  %vm312_vm5 = vweird.f32 %v820_v41  ;;  %v822_v60 = vpop.eup %821 }
 0x219   :  { %vm313_vm7 = vmor %vm311_vm6, %vm312_vm5  ;;  %v378_v63 = vsel %vm345_vm2, %v822_v60, 0.0  ;;  %v824_v2 = vpop.eup %823  ;;  %v589_v60 = vsel %vm573_vm9, %v562_v17, 0.0 }
 0x21a   :  { %v308_v44 = vsub.f32 1.0, %v307_v42  ;;  %v210_v7 = vsel %vm188_vm3, %v824_v2, 0.0  ;;  %v826_v12 = vpop.eup %825  ;;  %v559_v42 = vld [vmem:[%s1216_s7 + $0x10] sm:$0xff] }
 0x21b   :  { %v160_v14 = vsel %vm119_vm4, %v826_v12, 0.0  ;;  %v828_v36 = vpop.eup %827  ;;  %v580_v47 = vsel %vm573_vm9, %v559_v42, 0.0 }
 0x21c   :  { %v309_v46 = vmul.f32 %v820_v41, %v308_v44  ;;  %v130_v38 = vmul.f32 0.6931472, %v828_v36  ;;  %v567_v44 = vld [vmem:[%s1217_s8 + $0x10] sm:$0xff]  ;;  %v830_v9 = vpop.eup %829 }
 0x21d   :  { %v616_v48 = vsub.f32 %v567_v44, %v559_v42  ;;  %v199_v13 = vmul.f32 0.6931472, %v830_v9 }
 0x21e   :  { %v310_v49 = vadd.f32 %v820_v41, %v309_v46  ;;  %v131_v40 = vsub.f32 %v980_v35, %v130_v38 }
 0x220   :  { %v314_v51 = vsel %vm313_vm7, %v820_v41, %v310_v49  ;;  %v114_v41 = vpop.permute.xlu2 %113  ;;  %v624_v49 = vand.u32 2147483647, %v616_v48 }
 0x221   :  { %v319_v53 = vsel %vm316_vm8, %v318_v50, %v314_v51  ;;  %vm115_vm10 = vcmp.eq.s32.totalorder %v946_v4, %v114_v41  ;;  %v560_v51 = vld [vmem:[%s1216_s7 + $0x18] sm:$0xff] }
 0x222   :  { %v993_v54 = vmul.f32 %v319_v53, %v297_v32  ;;  %v614_v32 = vsub.f32 %v565_v30, %v557_v20  ;;  %v1052_v45 = vsel %vm115_vm10, 1.0, %v880_v6  ;;  %v636_v50 = vsel %vm573_vm9, %v624_v49, 0.0  ;;  %v568_v53 = vld [vmem:[%s1217_s8 + $0x18] sm:$0xff] }
 0x223   :  { %v132_v46 = vmul.f32 %v1052_v45, %v131_v40  ;;  %v617_v56 = vsub.f32 %v568_v53, %v560_v51  ;;  %v882_v49 = vmov 8.0  }
 0x224   :  { %v321_v55 = vsel %vm188_vm3, %v993_v54, -inf  ;;  %v622_v37 = vand.u32 2147483647, %v614_v32 }
 0x225   :  { %322 = vmax.xlane.f32.xlu1 %v321_v55  ;;  %v133_v35 = vsel %vm119_vm4, %v132_v46, 0.0  ;;  %v583_v55 = vsel %vm573_vm9, %v560_v51, 0.0  ;;  %v625_v57 = vand.u32 2147483647, %v617_v56 }
 0x226   :  { %v630_v39 = vsel %vm573_vm9, %v622_v37, 0.0  ;;  %134 = vadd.xlane.f32.xlu2 %v133_v35 }
 0x227   :  { %v639_v58 = vsel %vm573_vm9, %v625_v57, 0.0 }
 0x228   :  { %v635_v16 = vpop.xlane.xlu2 %634 }
 0x22d   :  { %379 = vadd.xlane.f32.xlu1 %v378_v63  ;;  %v564_v63 = vld [vmem:[%s1216_s7 + $0x38] sm:$0xff] }
 0x22e   :  { %v595_v0 = vsel %vm573_vm9, %v564_v63, 0.0 }
 0x230   :  { %v1085_v24 = vpop.xlane.xlu2 %643 }
 0x235   :  { %211 = vadd.xlane.f32.xlu1 %v210_v7  ;;  %v572_v7 = vld [vmem:[%s1217_s8 + $0x38] sm:$0xff] }
 0x236   :  { %v621_v11 = vsub.f32 %v572_v7, %v564_v63 }
 0x238   :  { %v629_v15 = vand.u32 2147483647, %v621_v11  ;;  %v647_v34 = vpop.xlane.xlu2 %646 }
 0x23a   :  { %v651_v18 = vsel %vm573_vm9, %v629_v15, 0.0 }
 0x23d   :  { %161 = vadd.xlane.f32.xlu1 %v160_v14 }
 0x240   :  { %v650_v44 = vpop.xlane.xlu2 %649 }
 0x245   :  { %575 = vadd.xlane.f32.xlu1 %v574_v23 }
 0x24d   :  { %578 = vadd.xlane.f32.xlu1 %v577_v33 }
 0x255   :  { %631 = vadd.xlane.f32.xlu1 %v630_v39 }
 0x25d   :  { %581 = vadd.xlane.f32.xlu1 %v580_v47 }
 0x265   :  { %637 = vadd.xlane.f32.xlu1 %v636_v50 }
 0x26d   :  { %584 = vadd.xlane.f32.xlu1 %v583_v55 }
 0x275   :  { %640 = vadd.xlane.f32.xlu1 %v639_v58 }
 0x27d   :  { %587 = vadd.xlane.f32.xlu1 %v586_v59 }
 0x285   :  { %590 = vadd.xlane.f32.xlu1 %v589_v60 }
 0x28d   :  { %593 = vadd.xlane.f32.xlu1 %v592_v62 }
 0x295   :  { %596 = vadd.xlane.f32.xlu1 %v595_v0 }
 0x298   :  { %v323_v1 = vpop.xlane.xlu1 %322 }
 0x299   :  { %v324_v2 = vsub.f32 %v993_v54, %v323_v1  ;;  %v200_v54 = vsub.f32 %v976_v27, %v199_v13  ;;  %v135_v50 = vpop.xlane.xlu2 %134 }
 0x29a   :  { %v136_v53 = vrot.slane %v135_v50, 4 }
 0x29b   :  { %v325_v5 = vmul.f32 1.442695, %v324_v2  ;;  %v201_v19 = vmul.f32 1.442695, %v200_v54 }
 0x29c   :  { %v137_v56 = vadd.f32 %v136_v53, %v135_v50 }
 0x29d   :  { %831 = vpow2.f32 %v325_v5 }
 0x29e   :  { %v138_v60 = vrot.slane %v137_v56, 2 }
 0x2a0   :  { %v1077_v10 = vpop.xlane.xlu1 %379  ;;  %v139_v63 = vadd.f32 %v138_v60, %v137_v56 }
 0x2a2   :  { %v140_v2 = vrot.slane %v139_v63, 1 }
 0x2a3   :  { %v1079_v12 = vpop.eup %831 }
 0x2a4   :  { %v327_v14 = vsel %vm188_vm3, %v1079_v12, 0.0  ;;  %v141_v11 = vadd.f32 %v140_v2, %v139_v63 }
 0x2a5   :  { %328 = vadd.xlane.f32.xlu0 %v327_v14 }
 0x2a6   :  { %778 = vpush %v141_v11 }
 0x2a8   :  { %v212_v17 = vpop.xlane.xlu1 %211 }
 0x2a9   :  { %833 = vlog2.f32 %v212_v17 }
 0x2aa   :  { %835 = vpow2.f32 %v201_v19 }
 0x2ad   :  { %652 = vadd.xlane.f32.xlu0 %v651_v18 }
 0x2af   :  { %v834_v20 = vpop.eup %833 }
 0x2b0   :  { %v214_v22 = vmul.f32 0.6931472, %v834_v20  ;;  %v162_v23 = vpop.xlane.xlu1 %161  ;;  %v836_v28 = vpop.eup %835 }
 0x2b1   :  { %837 = vlog2.f32 %v162_v23 }
 0x2b2   :  { %v215_v25 = vsub.f32 %v991_v52, %v214_v22  ;;  %839 = vrcp.f32 %v882_v49 }
 0x2b3   :  { %841 = vlog2.f32 %v1077_v10 }
 0x2b4   :  { %v216_v26 = vsub.f32 %v200_v54, %v215_v25  ;;  %843 = vlog2.f32 %v1010_v8 }
 0x2b6   :  { %v217_v29 = vmul.f32 %v836_v28, %v216_v26 }
 0x2b7   :  { %v838_v27 = vpop.eup %837 }
 0x2b8   :  { %v164_v30 = vmul.f32 0.6931472, %v838_v27  ;;  %v218_v31 = vsel %vm188_vm3, %v217_v29, 0.0  ;;  %v576_v32 = vpop.xlane.xlu1 %575  ;;  %v840_v58 = vpop.eup %839 }
 0x2b9   :  { %219 = vadd.xlane.f32.xlu0 %v218_v31  ;;  %vm598_vm11 = vcmp.ne.f32.partialorder %v576_v32, 0.0  ;;  %v145_v62 = vmul.f32 8.0, %v840_v58  ;;  %vm149_vm15 = vweird.f32 %v840_v58 }
 0x2ba   :  { %v165_v33 = vsub.f32 %v1004_v61, %v164_v30  ;;  %v687_v52 = vsel %vm598_vm11, 1.0, %v880_v6 }
 0x2bb   :  { %v695_v39 = vsel %vm662_vm12, %v687_v52, 0.0  ;;  %v146_v0 = vsub.f32 1.0, %v145_v62  ;;  %v842_v52 = vpop.eup %841 }
 0x2bc   :  { %v166_v36 = vmul.f32 %v1052_v45, %v165_v33 }
 0x2bd   :  { %v147_v7 = vmul.f32 %v840_v58, %v146_v0 }
 0x2be   :  { %v167_v37 = vsel %vm119_vm4, %v166_v36, 0.0 }
 0x2bf   :  { %168 = vadd.xlane.f32.xlu1 %v167_v37  ;;  %v148_v14 = vadd.f32 %v840_v58, %v147_v7 }
 0x2c0   :  { %v579_v38 = vpop.xlane.xlu1 %578 }
 0x2c1   :  { %vm599_vm13 = vcmp.ne.f32.partialorder %v579_v38, 0.0  ;;  %v150_v15 = vsel %vm149_vm15, %v840_v58, %v148_v14 }
 0x2c2   :  { %v688_v40 = vsel %vm599_vm13, 1.0, %v880_v6  ;;  %v655_v41 = vsel %vm599_vm13, %v635_v16, 0.0  ;;  %780 = vpush %v150_v15 }
 0x2c3   :  { %v696_v61 = vsel %vm662_vm12, %v688_v40, 0.0  ;;  %v664_v45 = vsel %vm662_vm12, %v655_v41, 0.0  ;;  %v883_v41 = vmov 4.0  }
 0x2c4   :  { %v697_v42 = vadd.f32 %v696_v61, %v695_v39  ;;  %v382_v39 = vmul.f32 0.6931472, %v842_v52 }
 0x2c6   :  { %v383_v61 = vsub.f32 %v988_v43, %v382_v39 }
 0x2c8   :  { %v632_v46 = vpop.xlane.xlu1 %631 }
 0x2c9   :  { %v654_v47 = vsel %vm598_vm11, %v632_v46, 0.0  ;;  %v384_v46 = vsel %vm345_vm2, %v383_v61, 0.0  ;;  %vm502_vm11 = vcmp.eq.s32.totalorder %v946_v4, 2 }
 0x2ca   :  { %v663_v48 = vsel %vm662_vm12, %v654_v47, 0.0 }
 0x2cb   :  { %v665_v35 = vadd.f32 %v664_v45, %v663_v48 }
 0x2d0   :  { %v582_v51 = vpop.xlane.xlu1 %581 }
 0x2d1   :  { %vm600_vm14 = vcmp.ne.f32.partialorder %v582_v51, 0.0  ;;  %v385_v51 = vrot.slane %v384_v46, 4 }
 0x2d2   :  { %v689_v55 = vsel %vm600_vm14, 1.0, %v880_v6 }
 0x2d3   :  { %v698_v57 = vsel %vm662_vm12, %v689_v55, 0.0 }
 0x2d4   :  { %v699_v59 = vadd.f32 %v698_v57, %v697_v42  ;;  %v386_v57 = vadd.f32 %v385_v51, %v384_v46 }
 0x2d7   :  { %s1167_s7 = spop %778 }
 0x2d8   :  { %v638_v1 = vpop.xlane.xlu1 %637  ;;  %s143_s4 = ssub.f32 0.0, %s1167_s7 }
 0x2d9   :  { %v656_v5 = vsel %vm600_vm14, %v638_v1, 0.0  ;;  %vm515_vm14 = vcmp.eq.s32.totalorder %v946_v4, 4 }
 0x2da   :  { %v666_v9 = vsel %vm662_vm12, %v656_v5, 0.0 }
 0x2db   :  { %v667_v13 = vadd.f32 %v666_v9, %v665_v35  ;;  %v387_v9 = vrot.slane %v386_v57, 2 }
 0x2e0   :  { %v585_v54 = vpop.xlane.xlu1 %584 }
 0x2e1   :  { %vm601_vm0 = vcmp.ne.f32.partialorder %v585_v54, 0.0 }
 0x2e2   :  { %v690_v16 = vsel %vm601_vm0, 1.0, %v880_v6 }
 0x2e3   :  { %v700_v17 = vsel %vm662_vm12, %v690_v16, 0.0 }
 0x2e4   :  { %v1105_v18 = vadd.f32 %v700_v17, %v699_v59 }
 0x2e8   :  { %v641_v19 = vpop.xlane.xlu1 %640 }
 0x2e9   :  { %v657_v20 = vsel %vm601_vm0, %v641_v19, 0.0  ;;  %v388_v19 = vadd.f32 %v387_v9, %v386_v57  ;;  %vm727_vm0 = vcmp.eq.s32.totalorder %v946_v4, 1 }
 0x2ea   :  { %v668_v22 = vsel %vm662_vm12, %v657_v20, 0.0 }
 0x2eb   :  { %v669_v23 = vadd.f32 %v668_v22, %v667_v13 }
 0x2f0   :  { %v1108_v25 = vpop.xlane.xlu1 %587 }
 0x2f1   :  { %vm602_vm1 = vcmp.ne.f32.partialorder %v1108_v25, 0.0 }
 0x2f2   :  { %v658_v26 = vsel %vm602_vm1, %v1085_v24, 0.0 }
 0x2f3   :  { %v670_v28 = vsel %vm662_vm12, %v658_v26, 0.0  ;;  %s1169_s8 = spop %780 }
 0x2f4   :  { %v671_v29 = vadd.f32 %v670_v28, %v669_v23 }
 0x2f8   :  { %v1115_v27 = vpop.xlane.xlu1 %590 }
 0x2f9   :  { %vm603_vm3 = vcmp.ne.f32.partialorder %v1115_v27, 0.0 }
 0x2fa   :  { %v659_v30 = vsel %vm603_vm3, %v647_v34, 0.0  ;;  %v844_v34 = vpop.eup %843 }
 0x2fb   :  { %v672_v31 = vsel %vm662_vm12, %v659_v30, 0.0  ;;  %v402_v40 = vmul.f32 0.6931472, %v844_v34 }
 0x2fc   :  { %v673_v32 = vadd.f32 %v672_v31, %v671_v29 }
 0x300   :  { %v1121_v33 = vpop.xlane.xlu1 %593 }
 0x301   :  { %vm604_vm4 = vcmp.ne.f32.partialorder %v1121_v33, 0.0 }
 0x302   :  { %v660_v24 = vsel %vm604_vm4, %v650_v44, 0.0  ;;  %v403_v44 = vsub.f32 %v972_v21, %v402_v40 }
 0x303   :  { %v674_v36 = vsel %vm662_vm12, %v660_v24, 0.0  ;;  %v389_v24 = vrot.slane %v388_v19, 1 }
 0x304   :  { %v1127_v37 = vadd.f32 %v674_v36, %v673_v32  ;;  %v405_v48 = vrot.slane %v403_v44, 4 }
 0x306   :  { %v407_v43 = vsel %vm345_vm2, %v405_v48, 0.0 }
 0x307   :  { %v408_v59 = vrot.slane %v407_v43, 4 }
 0x308   :  { %v1137_v60 = vpop.xlane.xlu1 %596 }
 0x309   :  { %v409_v11 = vadd.f32 %v408_v59, %v407_v43  ;;  %vm605_vm10 = vcmp.ne.f32.partialorder %v1137_v60, 0.0 }
 0x30b   :  { %v410_v26 = vrot.slane %v409_v11, 2 }
 0x30d   :  { %v411_v40 = vadd.f32 %v410_v26, %v409_v11 }
 0x318   :  { %v329_v38 = vpop.xlane.xlu0 %328 }
 0x319   :  { %845 = vrcp.f32 %v329_v38  ;;  %v341_v8 = vand.u32 2147483648, %v329_v38  ;;  %v339_v49 = vand.u32 2147483647, %v329_v38  ;;  %vm335_vm6 = vweird.f32 %v329_v38 }
 0x31a   :  { %847 = vrcp.f32 %v883_v41 }
 0x31b   :  { %v342_v21 = vor.u32 1.1754944e-38, %v341_v8  ;;  %vm340_vm8 = vcmp.eq.f32.partialorder %v339_v49, 8.507059e+37  ;;  %v412_v8 = vrot.slane %v411_v40, 1 }
 0x31f   :  { %v846_v42 = vpop.eup %845 }
 0x320   :  { %v331_v45 = vmul.f32 %v846_v42, %v329_v38  ;;  %v848_v10 = vpop.eup %847  ;;  %vm336_vm5 = vweird.f32 %v846_v42  ;;  %v1134_v50 = vpop.xlane.xlu0 %652 }
 0x321   :  { %v354_v55 = vmul.f32 4.0, %v848_v10  ;;  %vm337_vm7 = vmor %vm335_vm6, %vm336_vm5  ;;  %vm358_vm9 = vweird.f32 %v848_v10  ;;  %vm721_vm5 = vcmp.eq.s32.totalorder %v946_v4, 0 }
 0x322   :  { %v332_v47 = vsub.f32 1.0, %v331_v45 }
 0x323   :  { %v355_v63 = vsub.f32 1.0, %v354_v55 }
 0x324   :  { %v333_v35 = vmul.f32 %v846_v42, %v332_v47 }
 0x325   :  { %v356_v14 = vmul.f32 %v848_v10, %v355_v63 }
 0x326   :  { %v334_v53 = vadd.f32 %v846_v42, %v333_v35 }
 0x327   :  { %v357_v23 = vadd.f32 %v848_v10, %v356_v14 }
 0x328   :  { %v338_v56 = vsel %vm337_vm7, %v846_v42, %v334_v53  ;;  %v390_v42 = vadd.f32 %v389_v24, %v388_v19  ;;  %v413_v53 = vadd.f32 %v412_v8, %v411_v40 }
 0x329   :  { %v343_v58 = vsel %vm340_vm8, %v342_v21, %v338_v56  ;;  %v359_v52 = vsel %vm358_vm9, %v848_v10, %v357_v23 }
 0x32a   :  { %v344_v62 = vmul.f32 %v1079_v12, %v343_v58 }
 0x32c   :  { %v346_v0 = vsel %vm345_vm2, %v344_v62, 0.0  ;;  %v362_v1 = vrot.slane %v344_v62, 4  ;;  %v220_v2 = vpop.xlane.xlu0 %219  ;;  %v691_v62 = vsel %vm602_vm1, 1.0, %v880_v6  ;;  %vm522_vm1 = vcmp.eq.s32.totalorder %v946_v4, 5 }
 0x32d   :  { %v347_v5 = vrot.slane %v346_v0, 4  ;;  %v221_v7 = vrot.slane %v220_v2, 4 }
 0x32e   :  { %v364_v13 = vsel %vm345_vm2, %v362_v1, 0.0  ;;  %vm417_vm2 = vcmask 57344   ;;  %v702_v1 = vsel %vm662_vm12, %v691_v62, 0.0 }
 0x32f   :  { %v348_v15 = vadd.f32 %v347_v5, %v346_v0  ;;  %v365_v54 = vrot.slane %v364_v13, 4  ;;  %v222_v16 = vadd.f32 %v221_v7, %v220_v2  ;;  %v692_v5 = vsel %vm603_vm3, 1.0, %v880_v6 }
 0x330   :  { %v703_v9 = vadd.f32 %v702_v1, %v1105_v18  ;;  %v704_v25 = vsel %vm662_vm12, %v692_v5, 0.0  ;;  %v694_v18 = vsel %vm605_vm10, 1.0, %v880_v6 }
 0x331   :  { %v349_v17 = vrot.slane %v348_v15, 2  ;;  %v366_v20 = vadd.f32 %v365_v54, %v364_v13  ;;  %v223_v22 = vrot.slane %v222_v16, 2  ;;  %v693_v13 = vsel %vm604_vm4, 1.0, %v880_v6 }
 0x332   :  { %v169_v12 = vpop.xlane.xlu1 %168  ;;  %v705_v27 = vadd.f32 %v704_v25, %v703_v9  ;;  %v706_v54 = vsel %vm662_vm12, %v693_v13, 0.0  ;;  %v708_v60 = vsel %vm662_vm12, %v694_v18, 0.0 }
 0x333   :  { %v170_v28 = vrot.slane %v169_v12, 4  ;;  %v350_v29 = vadd.f32 %v349_v17, %v348_v15  ;;  %v367_v30 = vrot.slane %v366_v20, 2  ;;  %v224_v34 = vadd.f32 %v223_v22, %v222_v16 }
 0x334   :  { %v661_v15 = vsel %vm605_vm10, %v1134_v50, 0.0  ;;  %v707_v19 = vadd.f32 %v706_v54, %v705_v27 }
 0x335   :  { %v171_v31 = vadd.f32 %v170_v28, %v169_v12  ;;  %v351_v32 = vrot.slane %v350_v29, 1  ;;  %v368_v36 = vadd.f32 %v367_v30, %v366_v20  ;;  %v225_v46 = vrot.slane %v224_v34, 1 }
 0x336   :  { %v676_v17 = vsel %vm662_vm12, %v661_v15, 0.0  ;;  %v709_v20 = vadd.f32 %v708_v60, %v707_v19  ;;  %vm508_vm12 = vcmp.eq.s32.totalorder %v946_v4, 3 }
 0x337   :  { %v172_v38 = vrot.slane %v171_v31, 2  ;;  %v352_v39 = vadd.f32 %v351_v32, %v350_v29  ;;  %v369_v41 = vrot.slane %v368_v36, 1  ;;  %v226_v10 = vadd.f32 %v225_v46, %v224_v34 }
 0x338   :  { %v677_v33 = vadd.f32 %v676_v17, %v1127_v37  ;;  %v98_v17 = vshrl.u32 %v97_v3, 7 }
 0x339   :  { %v360_v61 = vmul.f32 %v359_v52, %v352_v39  ;;  %v173_v44 = vadd.f32 %v172_v38, %v171_v31  ;;  %v370_v45 = vadd.f32 %v369_v41, %v368_v36 }
 0x33a   :  { %vm501_vm13 = vcmp.eq.s32.totalorder %v98_v17, 0 }
 0x33b   :  { %v441_v47 = vmul.f32 %v390_v42, %v360_v61  ;;  %v174_v48 = vrot.slane %v173_v44, 1  ;;  %849 = vlog2.f32 %v360_v61  ;;  %v371_v35 = vmul.f32 %v370_v45, %v359_v52  ;;  %vm1184_vm15 = vmand %vm501_vm13, %vm502_vm11 }
 0x33c   :  { %v480_v43 = vmul.f32 %v413_v53, %v360_v61  ;;  %vm509_vm3 = vmand %vm501_vm13, %vm508_vm12  ;;  %v772_v19 = vsel %vm1184_vm15, 1.0, %v880_v6 }
 0x33d   :  { %v442_v49 = vsel %vm417_vm2, %v441_v47, 0.0  ;;  %v175_v51 = vadd.f32 %v174_v48, %v173_v44  ;;  %851 = vlog2.f32 %v371_v35  ;;  %v454_v7 = vmul.f32 %v390_v42, %v371_v35  ;;  %vm516_vm4 = vmand %vm501_vm13, %vm515_vm14 }
 0x33e   :  { %443 = vadd.xlane.f32.xlu0 %v442_v49  ;;  %v481_v58 = vsel %vm417_vm2, %v480_v43, 0.0  ;;  %v467_v11 = vmul.f32 %v413_v53, %v371_v35  ;;  %vm728_vm6 = vmand %vm501_vm13, %vm727_vm0  ;;  %v773_v60 = vsel %vm509_vm3, 1.0, %v880_v6 }
 0x33f   :  { %782 = vpush %v175_v51  ;;  %v455_v14 = vsel %vm417_vm2, %v454_v7, 0.0  ;;  %vm523_vm7 = vmand %vm501_vm13, %vm522_vm1 }
 0x340   :  { %784 = vpush %v226_v10  ;;  %v468_v16 = vsel %vm417_vm2, %v467_v11, 0.0  ;;  %vm722_vm8 = vmand %vm501_vm13, %vm721_vm5 }
 0x341   :  { %v850_v55 = vpop.eup %849 }
 0x342   :  { %v415_v21 = vmul.f32 0.6931472, %v850_v55 }
 0x343   :  { %v852_v56 = vpop.eup %851 }
 0x344   :  { %v416_v57 = vmul.f32 %v415_v21, %v360_v61  ;;  %v429_v59 = vmul.f32 0.6931472, %v852_v56 }
 0x346   :  { %482 = vadd.xlane.f32.xlu0 %v481_v58  ;;  %v418_v63 = vsel %vm417_vm2, %v416_v57, 0.0  ;;  %v430_v0 = vmul.f32 %v429_v59, %v371_v35 }
 0x347   :  { %419 = vadd.xlane.f32.xlu2 %v418_v63 }
 0x348   :  { %v431_v2 = vsel %vm417_vm2, %v430_v0, 0.0 }
 0x349   :  { %432 = vadd.xlane.f32.xlu1 %v431_v2 }
 0x34f   :  { %456 = vadd.xlane.f32.xlu2 %v455_v14 }
 0x351   :  { %469 = vadd.xlane.f32.xlu1 %v468_v16 }
 0x357   :  { %678 = vadd.xlane.f32.xlu2 %v677_v33 }
 0x359   :  { %710 = vadd.xlane.f32.xlu1 %v709_v20  ;;  %v774_v20 = vsel %vm516_vm4, 1.0, %v880_v6 }
 0x370   :  { %s1171_s20 = spop %782 }
 0x371   :  { %s1173_s21 = spop %784  ;;  %s177_s28 = ssub.f32 0.0, %s1171_s20 }
 0x372   :  { %s236_s17 = smul.f32 %s1173_s21, %s1169_s8 }
 0x373   :  { %s186_s0 = smul.f32 %s1169_s8, %s177_s28 }
 0x374   :  { %s152_s20 = smul.f32 %s1169_s8, %s143_s4  ;;  %v506_v33 = vstv %s236_s17  ;;  %s885_s8 = smov [#allocation3]  }
 0x375   :  { %v519_v4 = vstv %s186_s0 }
 0x3b1   :  { %v444_v50 = vpop.xlane.xlu0 %443 }
 0x3b2   :  { %v445_v22 = vrot.slane %v444_v50, 4 }
 0x3b4   :  { %v446_v12 = vadd.f32 %v445_v22, %v444_v50  ;;  %v777_v22 = vsel %vm728_vm6, 1.0, %v880_v6 }
 0x3b6   :  { %v447_v29 = vrot.slane %v446_v12, 2 }
 0x3b8   :  { %v448_v38 = vadd.f32 %v447_v29, %v446_v12  ;;  %v526_v29 = vstv %s152_s20 }
 0x3b9   :  { %v483_v23 = vpop.xlane.xlu0 %482 }
 0x3ba   :  { %v420_v26 = vpop.xlane.xlu2 %419  ;;  %v484_v30 = vrot.slane %v483_v23, 4  ;;  %v449_v48 = vrot.slane %v448_v38, 1 }
 0x3bb   :  { %v421_v28 = vrot.slane %v420_v26, 4 }
 0x3bc   :  { %v433_v32 = vpop.xlane.xlu1 %432  ;;  %v485_v34 = vadd.f32 %v484_v30, %v483_v23  ;;  %v450_v55 = vadd.f32 %v449_v48, %v448_v38  ;;  %v507_v23 = vmul.f32 %v772_v19, %v506_v33  ;;  %v776_v30 = vsel %vm722_vm8, 1.0, %v880_v6 }
 0x3bd   :  { %v422_v31 = vadd.f32 %v421_v28, %v420_v26  ;;  %v434_v24 = vrot.slane %v433_v32, 4  ;;  %v775_v28 = vsel %vm523_vm7, 1.0, %v880_v6 }
 0x3be   :  { %v486_v44 = vrot.slane %v485_v34, 2 }
 0x3bf   :  { %v423_v36 = vrot.slane %v422_v31, 2  ;;  %v435_v52 = vadd.f32 %v434_v24, %v433_v32  ;;  %v520_v32 = vmul.f32 %v774_v20, %v519_v4 }
 0x3c0   :  { %v487_v53 = vadd.f32 %v486_v44, %v485_v34 }
 0x3c1   :  { %v424_v37 = vadd.f32 %v423_v36, %v422_v31  ;;  %v436_v39 = vrot.slane %v435_v52, 2 }
 0x3c2   :  { %v457_v40 = vpop.xlane.xlu2 %456  ;;  %v488_v1 = vrot.slane %v487_v53, 1 }
 0x3c3   :  { %v458_v41 = vrot.slane %v457_v40, 4  ;;  %v425_v61 = vrot.slane %v424_v37, 1  ;;  %v437_v42 = vadd.f32 %v436_v39, %v435_v52  ;;  %v527_v52 = vmul.f32 %v775_v28, %v526_v29 }
 0x3c4   :  { %v470_v46 = vpop.xlane.xlu1 %469  ;;  %v489_v13 = vadd.f32 %v488_v1, %v487_v53 }
 0x3c5   :  { %v459_v45 = vadd.f32 %v458_v41, %v457_v40  ;;  %v426_v47 = vadd.f32 %v425_v61, %v424_v37  ;;  %v471_v8 = vrot.slane %v470_v46, 4  ;;  %v438_v35 = vrot.slane %v437_v42, 1 }
 0x3c7   :  { %v460_v49 = vrot.slane %v459_v45, 2  ;;  %786 = vpush %v426_v47  ;;  %v472_v51 = vadd.f32 %v471_v8, %v470_v46  ;;  %v439_v10 = vadd.f32 %v438_v35, %v437_v42 }
 0x3c9   :  { %v461_v43 = vadd.f32 %v460_v49, %v459_v45  ;;  %v473_v21 = vrot.slane %v472_v51, 2  ;;  %788 = vpush %v439_v10 }
 0x3ca   :  { %v679_v56 = vpop.xlane.xlu2 %678  ;;  %790 = vpush %v450_v55 }
 0x3cb   :  { %v680_v57 = vrot.slane %v679_v56, 4  ;;  %v462_v58 = vrot.slane %v461_v43, 1  ;;  %v474_v59 = vadd.f32 %v473_v21, %v472_v51 }
 0x3cc   :  { %v711_v63 = vpop.xlane.xlu1 %710 }
 0x3cd   :  { %v681_v62 = vadd.f32 %v680_v57, %v679_v56  ;;  %v463_v0 = vadd.f32 %v462_v58, %v461_v43  ;;  %v712_v2 = vrot.slane %v711_v63, 4  ;;  %v475_v5 = vrot.slane %v474_v59, 1 }
 0x3cf   :  { %v682_v7 = vrot.slane %v681_v62, 2  ;;  %792 = vpush %v463_v0  ;;  %v713_v9 = vadd.f32 %v712_v2, %v711_v63  ;;  %v476_v25 = vadd.f32 %v475_v5, %v474_v59 }
 0x3d1   :  { %v683_v11 = vadd.f32 %v682_v7, %v681_v62  ;;  %v714_v14 = vrot.slane %v713_v9, 2  ;;  %794 = vpush %v476_v25 }
 0x3d2   :  { %796 = vpush %v489_v13 }
 0x3d3   :  { %v684_v15 = vrot.slane %v683_v11, 1  ;;  %v715_v27 = vadd.f32 %v714_v14, %v713_v9 }
 0x3d5   :  { %v685_v54 = vadd.f32 %v684_v15, %v683_v11  ;;  %v716_v16 = vrot.slane %v715_v27, 1 }
 0x3d7   :  { %798 = vpush %v685_v54  ;;  %v717_v18 = vadd.f32 %v716_v16, %v715_v27 }
 0x3d9   :  { %800 = vpush %v717_v18 }
 0x3f8   :  { %s787_s22 = spop %786 }
 0x3fa   :  { %s789_s23 = spop %788 }
 0x3fb   :  { %s791_s24 = spop %790 }
 0x3fc   :  { %s452_s25 = smul.f32 0.25, %s791_s24 }
 0x3fe   :  { %s453_s26 = ssub.f32 %s787_s22, %s452_s25  ;;  %s748_s25 = sshll.u32 %s1218_s9, 4  ;;  %s749_s25 = int_to_ptr.hbm [resolvable:$true] %s748_s25 }
 0x400   :  { %s793_s27 = spop %792  ;;  %s493_s30 = sadd.f32 0.5, %s453_s26 }
 0x401   :  { %s465_s29 = smul.f32 0.25, %s793_s27 }
 0x402   :  { %s795_s11 = spop %794 }
 0x403   :  { %s466_s10 = ssub.f32 %s789_s23, %s465_s29  ;;  %s478_s12 = smul.f32 0.25, %s795_s11 }
 0x404   :  { %s797_s1 = spop %796 }
 0x405   :  { %s494_s6 = ssub.f32 %s493_s30, %s466_s10  ;;  %s491_s13 = smul.f32 0.25, %s797_s1 }
 0x406   :  { %s479_s14 = ssub.f32 %s789_s23, %s478_s12 }
 0x407   :  { %s492_s15 = ssub.f32 %s787_s22, %s491_s13  ;;  %s495_s5 = smax.f32 %s884_s3, %s494_s6 }
 0x408   :  { %s496_s16 = sadd.f32 0.5, %s479_s14  ;;  %s799_s18 = spop %798 }
 0x409   :  { %v725_v31 = vstv %s799_s18  ;;  %s746_s22 = sshll.u32 %s885_s8, 4  ;;  %s747_s22 = int_to_ptr.vmem [resolvable:$true] %s746_s22 }
 0x40a   :  { %s497_s2 = ssub.f32 %s496_s16, %s492_s15  ;;  %s801_s7 = spop %800  ;;  %v726_v34 = vmul.f32 %v776_v30, %v725_v31 }
 0x40b   :  { %v731_v12 = vstv %s801_s7 }
 0x40c   :  { %s498_s19 = smax.f32 %s884_s3, %s497_s2  ;;  %v732_v24 = vmul.f32 %v777_v22, %v731_v12 }
 0x40d   :  { %s499_s21 = sadd.f32 %s498_s19, %s495_s5 }
 0x40e   :  { %v733_v38 = vadd.f32 %v732_v24, %v726_v34 }
 0x40f   :  { %v512_v50 = vstv %s499_s21 }
 0x410   :  { %v513_v26 = vmul.f32 %v773_v60, %v512_v50 }
 0x412   :  { %v514_v36 = vadd.f32 %v513_v26, %v507_v23 }
 0x414   :  { %v521_v37 = vadd.f32 %v520_v32, %v514_v36 }
 0x416   :  { %v528_v39 = vadd.f32 %v527_v52, %v521_v37 }
 0x418   :  { %v734_v40 = vadd.f32 %v733_v38, %v528_v39 }
 0x41a   :  { %740 = vst [vmem:[#allocation3] sm:$0xff] %v734_v40 }
 0x41b   :  { %751 = dma.vmem_to_hbm [thread:$0]  %s747_s22, 128, %s749_s25, [#allocation4]  }
 0x41c   :  { %877 = dma.done.wait [#allocation4], 128  }
 0x41d   :  { %878 = vsyncadd [#allocation4], 4294967168 }
 0x41e   :  { %756 = vsyncpa [#allocation4], 1 }

</bundles_post_ra>
